<compile_context>
chip_gen: v7x
topology: tpu7x:2x2x1
jax: 0.10.0
libtpu: 0.0.40
codegen_flags: <defaults>
</compile_context>

<pallas_src>
import functools
import math

import jax
import jax.numpy as jnp
from jax import lax
from jax.experimental import pallas as pl
from jax.experimental.pallas import tpu as pltpu


# ---------------------------------------------------------------------------
# Generation-dependent VMEM budgets.
# ---------------------------------------------------------------------------
def _vmem_capacity_bytes() -> int:
    try:
        cap = int(pltpu.get_tpu_info().vmem_capacity_bytes)
        if cap >= 32 * 1024 * 1024:
            return cap
    except Exception:
        pass
    return 64 * 1024 * 1024          # conservative (v7x-sized) fallback


_VMEM_CAP = _vmem_capacity_bytes()
# ~96 MiB limit on 128 MiB parts (v5e/v6e), ~48 MiB on 64 MiB parts (v7x).
_VMEM_LIMIT_BYTES = min(_VMEM_CAP * 3 // 4, 100 * 1024 * 1024)
_VMEM_TILE_BUDGET = int(_VMEM_LIMIT_BYTES * 0.8)

_MASK_VALUE = -1e30


def _round_up(n: int, m: int) -> int:
    return ((n + m - 1) // m) * m


# ---------------------------------------------------------------------------
# One-time parameter preparation (hoisted out of the forward path).
# ---------------------------------------------------------------------------
def prepare_params(params, *, n_heads, compute_dtype=jnp.bfloat16):
    """Transpose PyTorch (out,in) weights to (in,out), fold the 1/sqrt(Dh)
    attention scale into the Q projection, and store matmul weights in
    `compute_dtype` (bf16 for the MXU). Biases stay f32."""
    e = params["w_query"].shape[1]
    assert e % n_heads == 0
    scale = 1.0 / math.sqrt(e // n_heads)

    def w_t(w, s=1.0):
        return (jnp.asarray(w, jnp.float32).T * s).astype(compute_dtype)

    def bias(b, s=1.0):
        if b is None:
            return jnp.zeros((1, e), jnp.float32)
        return (jnp.asarray(b, jnp.float32) * s).reshape(1, e)

    return {
        "wq_t": w_t(params["w_query"], scale),
        "wk_t": w_t(params["w_key"]),
        "wv_t": w_t(params["w_value"]),
        "wo_t": w_t(params["out"]),
        "bq": bias(params.get("b_query"), scale),
        "bk": bias(params.get("b_key")),
        "bv": bias(params.get("b_value")),
        "bo": bias(params.get("b_out")),
        "n_heads": n_heads,
    }


# ---------------------------------------------------------------------------
# QKV projection kernel (x read once per row tile, three lane-dense outputs).
# ---------------------------------------------------------------------------
def _qkv_proj_kernel(x_ref, wq_ref, wk_ref, wv_ref, bq_ref, bk_ref, bv_ref,
                     q_ref, k_ref, v_ref):
    x = x_ref[...].astype(wq_ref.dtype)           # bf16 MXU operands
    q = jnp.dot(x, wq_ref[...], preferred_element_type=jnp.float32) + bq_ref[...]
    k = jnp.dot(x, wk_ref[...], preferred_element_type=jnp.float32) + bk_ref[...]
    v = jnp.dot(x, wv_ref[...], preferred_element_type=jnp.float32) + bv_ref[...]
    q_ref[...] = q.astype(q_ref.dtype)
    k_ref[...] = k.astype(k_ref.dtype)
    v_ref[...] = v.astype(v_ref.dtype)


def qkv_projection(x2, wq_t, wk_t, wv_t, bq, bk, bv, *, out_dtype,
                   block_rows=256):
    rows, e_in = x2.shape
    e_out = wq_t.shape[1]
    wbytes = jnp.dtype(wq_t.dtype).itemsize
    xbytes = jnp.dtype(x2.dtype).itemsize
    obytes = jnp.dtype(out_dtype).itemsize

    # TODO(synk): for very large E the resident weights should also be tiled
    # over N/K with an accumulator scratch; here they stay VMEM-resident.
    fixed = 3 * (e_in * e_out * wbytes + e_out * 4) * 2        # weights + biases
    per_row = (e_in * xbytes + 3 * e_out * obytes) * 2         # x + q/k/v (dbl-buf)
    max_rows = max(16, (_VMEM_TILE_BUDGET - fixed) // max(per_row, 1))
    br = min(block_rows, _round_up(rows, 16), max_rows)
    br = max(16, (br // 16) * 16)
    rows_p = _round_up(rows, br)
    x_p = x2 if rows_p == rows else jnp.pad(x2, ((0, rows_p - rows), (0, 0)))

    out_sds = jax.ShapeDtypeStruct((rows_p, e_out), out_dtype)
    row_spec = pl.BlockSpec((br, e_in), lambda i: (i, 0))
    out_spec = pl.BlockSpec((br, e_out), lambda i: (i, 0))
    w_spec = pl.BlockSpec((e_in, e_out), lambda i: (0, 0))
    b_spec = pl.BlockSpec((1, e_out), lambda i: (0, 0))

    q, k, v = pl.pallas_call(
        _qkv_proj_kernel,
        out_shape=(out_sds, out_sds, out_sds),
        grid_spec=pltpu.PrefetchScalarGridSpec(
            num_scalar_prefetch=0,
            grid=(rows_p // br,),
            in_specs=[row_spec, w_spec, w_spec, w_spec, b_spec, b_spec, b_spec],
            out_specs=[out_spec, out_spec, out_spec],
        ),
        compiler_params=pltpu.CompilerParams(
            dimension_semantics=("parallel",),
            vmem_limit_bytes=_VMEM_LIMIT_BYTES,
        ),
    )(x_p, wq_t, wk_t, wv_t, bq, bk, bv)
    if rows_p != rows:
        q, k, v = q[:rows], k[:rows], v[:rows]
    return q, k, v


# ---------------------------------------------------------------------------
# Output projection kernel: y = x @ w + b.
# ---------------------------------------------------------------------------
def _linear_kernel(x_ref, w_ref, b_ref, o_ref):
    x = x_ref[...].astype(w_ref.dtype)
    acc = jnp.dot(x, w_ref[...], preferred_element_type=jnp.float32) + b_ref[...]
    o_ref[...] = acc.astype(o_ref.dtype)


def linear_pallas(x2, w_t, b, *, out_dtype=None, block_rows=256):
    rows, e_in = x2.shape
    e_out = w_t.shape[1]
    out_dtype = out_dtype or x2.dtype
    wbytes = jnp.dtype(w_t.dtype).itemsize
    fixed = (e_in * e_out * wbytes + e_out * 4) * 2
    per_row = (e_in * jnp.dtype(x2.dtype).itemsize
               + e_out * jnp.dtype(out_dtype).itemsize) * 2
    max_rows = max(16, (_VMEM_TILE_BUDGET - fixed) // max(per_row, 1))
    br = min(block_rows, _round_up(rows, 16), max_rows)
    br = max(16, (br // 16) * 16)
    rows_p = _round_up(rows, br)
    x_p = x2 if rows_p == rows else jnp.pad(x2, ((0, rows_p - rows), (0, 0)))

    out = pl.pallas_call(
        _linear_kernel,
        out_shape=jax.ShapeDtypeStruct((rows_p, e_out), out_dtype),
        grid_spec=pltpu.PrefetchScalarGridSpec(
            num_scalar_prefetch=0,
            grid=(rows_p // br,),
            in_specs=[
                pl.BlockSpec((br, e_in), lambda i: (i, 0)),
                pl.BlockSpec((e_in, e_out), lambda i: (0, 0)),
                pl.BlockSpec((1, e_out), lambda i: (0, 0)),
            ],
            out_specs=pl.BlockSpec((br, e_out), lambda i: (i, 0)),
        ),
        compiler_params=pltpu.CompilerParams(
            dimension_semantics=("parallel",),
            vmem_limit_bytes=_VMEM_LIMIT_BYTES,
        ),
    )(x_p, w_t, b)
    return out[:rows] if rows_p != rows else out


# ---------------------------------------------------------------------------
# Flash-style causal attention kernel (all heads per step, heads in lanes).
# ---------------------------------------------------------------------------
def _flash_attn_kernel(q_ref, k_ref, v_ref, o_ref, acc_ref, m_ref, l_ref,
                       *, n_heads, head_dim, block_q, block_k):
    qi = pl.program_id(1)
    ki = pl.program_id(2)

    @pl.when(ki == 0)
    def _init():
        m_ref[...] = jnp.full_like(m_ref, _MASK_VALUE)
        l_ref[...] = jnp.zeros_like(l_ref)
        acc_ref[...] = jnp.zeros_like(acc_ref)

    @pl.when(ki <= qi)                      # causal block skip above diagonal
    def _compute():
        q = q_ref[...]                       # (block_q, E), scale pre-folded into Wq
        k = k_ref[...]                       # (block_k, E)
        v = v_ref[...]
        row = qi * block_q + lax.broadcasted_iota(jnp.int32, (block_q, block_k), 0)
        col = ki * block_k + lax.broadcasted_iota(jnp.int32, (block_q, block_k), 1)
        causal = col <= row                  # also masks padded key columns
        for h in range(n_heads):             # static unroll; heads live in lanes
            sl = slice(h * head_dim, (h + 1) * head_dim)
            s = lax.dot_general(q[:, sl], k[:, sl], (((1,), (1,)), ((), ())),
                                preferred_element_type=jnp.float32)
            s = jnp.where(causal, s, _MASK_VALUE)
            m_prev = m_ref[:, h:h + 1]
            l_prev = l_ref[:, h:h + 1]
            m_new = jnp.maximum(m_prev, jnp.max(s, axis=-1, keepdims=True))
            alpha = jnp.exp(m_prev - m_new)
            p = jnp.exp(s - m_new)           # unnormalized (deferred softmax norm)
            l_ref[:, h:h + 1] = alpha * l_prev + jnp.sum(p, axis=-1, keepdims=True)
            m_ref[:, h:h + 1] = m_new
            acc_ref[:, sl] = alpha * acc_ref[:, sl] + jnp.dot(
                p.astype(v.dtype), v[:, sl], preferred_element_type=jnp.float32)

    @pl.when(ki == qi)                       # last un-skipped KV block
    def _finalize():
        inv_l = pl.reciprocal(l_ref[...], approx=True)        # (block_q, H) on EUP
        ctx = jnp.concatenate(
            [acc_ref[:, h * head_dim:(h + 1) * head_dim] * inv_l[:, h:h + 1]
             for h in range(n_heads)], axis=1)
        o_ref[...] = ctx.astype(o_ref.dtype)                   # lane-dense store


def causal_attention_pallas(q, k, v, *, n_heads, block_q=128, block_k=128,
                            out_dtype=None):
    """q/k/v: (B, T, E) with heads packed along E -> context (B, T, E)."""
    B, T, E = q.shape
    assert E % n_heads == 0
    head_dim = E // n_heads
    out_dtype = out_dtype or q.dtype

    bq = max(8, min(block_q, _round_up(T, 8)))
    bk = bq                                   # equal blocks: diagonal <=> (ki == qi)
    t_p = _round_up(T, bq)
    if t_p != T:
        pad = ((0, 0), (0, t_p - T), (0, 0))
        q, k, v = jnp.pad(q, pad), jnp.pad(k, pad), jnp.pad(v, pad)
    n_q = t_p // bq
    n_kv = t_p // bk

    q_spec = pl.BlockSpec((None, bq, E), lambda b, qi, ki: (b, qi, 0))
    # Clamp the KV block index for skipped (above-diagonal) steps so their
    # blocks are never re-fetched from HBM.
    kv_spec = pl.BlockSpec((None, bk, E),
                           lambda b, qi, ki: (b, jnp.minimum(ki, qi), 0))
    out_spec = pl.BlockSpec((None, bq, E), lambda b, qi, ki: (b, qi, 0))

    kernel = functools.partial(_flash_attn_kernel, n_heads=n_heads,
                               head_dim=head_dim, block_q=bq, block_k=bk)
    ctx = pl.pallas_call(
        kernel,
        out_shape=jax.ShapeDtypeStruct((B, t_p, E), out_dtype),
        grid_spec=pltpu.PrefetchScalarGridSpec(
            num_scalar_prefetch=0,
            grid=(B, n_q, n_kv),
            in_specs=[q_spec, kv_spec, kv_spec],
            out_specs=out_spec,
            scratch_shapes=[
                pltpu.VMEM((bq, E), jnp.float32),          # context accumulator
                pltpu.VMEM((bq, n_heads), jnp.float32),    # running max m
                pltpu.VMEM((bq, n_heads), jnp.float32),    # running sum l
            ],
        ),
        compiler_params=pltpu.CompilerParams(
            dimension_semantics=("parallel", "parallel", "arbitrary"),
            vmem_limit_bytes=_VMEM_LIMIT_BYTES,
        ),
    )(q, k, v)
    return ctx[:, :T] if t_p != T else ctx


# ---------------------------------------------------------------------------
# Full MultiHeadAttention forward (matches the PyTorch module semantics).
# ---------------------------------------------------------------------------
def multi_head_attention(x, prepared, *, block_q=128, block_k=128):
    B, T, E = x.shape
    n_heads = prepared["n_heads"]
    x2 = x.reshape(B * T, E)

    qkv_dtype = prepared["wq_t"].dtype        # bf16 intermediates (f32 accumulate)
    q2, k2, v2 = qkv_projection(
        x2, prepared["wq_t"], prepared["wk_t"], prepared["wv_t"],
        prepared["bq"], prepared["bk"], prepared["bv"], out_dtype=qkv_dtype)

    q = q2.reshape(B, T, E)                    # free views; no transposes anywhere
    k = k2.reshape(B, T, E)
    v = v2.reshape(B, T, E)

    # TODO(synk): attention-weight dropout omitted (eval/inference semantics).
    ctx = causal_attention_pallas(q, k, v, n_heads=n_heads,
                                  block_q=block_q, block_k=block_k,
                                  out_dtype=x.dtype)           # (B, T, E)

    out = linear_pallas(ctx.reshape(B * T, E), prepared["wo_t"], prepared["bo"],
                        out_dtype=x.dtype)
    return out.reshape(B, T, E)


# ---------------------------------------------------------------------------
# Pure-JAX f32 reference (mirrors the PyTorch forward, dropout in eval mode).
# ---------------------------------------------------------------------------
def mha_reference(x, params, *, n_heads):
    B, T, E = x.shape
    Dh = E // n_heads

    def lin(z, w, b):
        y = z @ w.T
        return y if b is None else y + b

    q = lin(x, params["w_query"], params.get("b_query"))
    k = lin(x, params["w_key"], params.get("b_key"))
    v = lin(x, params["w_value"], params.get("b_value"))
    q = q.reshape(B, T, n_heads, Dh).transpose(0, 2, 1, 3)
    k = k.reshape(B, T, n_heads, Dh).transpose(0, 2, 1, 3)
    v = v.reshape(B, T, n_heads, Dh).transpose(0, 2, 1, 3)

    scores = q @ jnp.swapaxes(k, -1, -2)
    mask = jnp.triu(jnp.ones((T, T), dtype=bool), k=1)
    scores = jnp.where(mask, -jnp.inf, scores)
    w = jax.nn.softmax(scores / (Dh ** 0.5), axis=-1)
    ctx = w @ v
    ctx = ctx.transpose(0, 2, 1, 3).reshape(B, T, E)
    return lin(ctx, params["out"], params.get("b_out"))


if __name__ == "__main__":
    # cfg = {'emb_dim': 32, 'n_heads': 4, 'context_length': 8,
    #        'dropout': 0.0, 'qkv_bias': True}; batch=2, seq=8
    emb_dim, n_heads, context_length = 32, 4, 8
    batch, seq = 2, 8
    qkv_bias = True

    key = jax.random.PRNGKey(0)
    kx, kq, kk, kv, ko, kbq, kbk, kbv, kbo = jax.random.split(key, 9)

    x = jax.random.normal(kx, (batch, seq, emb_dim), dtype=jnp.float32)
    wstd = 1.0 / (emb_dim ** 0.5)
    params = {
        "w_query": jax.random.normal(kq, (emb_dim, emb_dim), jnp.float32) * wstd,
        "w_key":   jax.random.normal(kk, (emb_dim, emb_dim), jnp.float32) * wstd,
        "w_value": jax.random.normal(kv, (emb_dim, emb_dim), jnp.float32) * wstd,
        "out":     jax.random.normal(ko, (emb_dim, emb_dim), jnp.float32) * wstd,
    }
    if qkv_bias:
        params["b_query"] = jax.random.normal(kbq, (emb_dim,), jnp.float32) * 0.02
        params["b_key"]   = jax.random.normal(kbk, (emb_dim,), jnp.float32) * 0.02
        params["b_value"] = jax.random.normal(kbv, (emb_dim,), jnp.float32) * 0.02
        params["b_out"]   = jax.random.normal(kbo, (emb_dim,), jnp.float32) * 0.02

    # One-time weight-layout / precision prep (hoisted out of the forward path).
    prepared = prepare_params(params, n_heads=n_heads)

    fwd = jax.jit(lambda xx: multi_head_attention(xx, prepared))
    y = jax.block_until_ready(fwd(x))

    ref = mha_reference(x, params, n_heads=n_heads)
    assert y.shape == (batch, seq, emb_dim)
    # bf16 MXU operands / bf16 q,k,v intermediates -> looser-than-f32 tolerance.
    err = jnp.max(jnp.abs(y - ref))
    assert jnp.allclose(y, ref, atol=5e-2, rtol=5e-2), (
        f"mismatch vs reference; max abs diff = {err}")

    print("KERNEL_OK")
</pallas_src>

<mosaic_0001>
module attributes {stable_mosaic.version = 11 : i64} {
  func.func @_qkv_proj_kernel(%arg0: i32, %arg1: memref<16x32xf32, #tpu.memory_space<vmem>>, %arg2: memref<32x32xbf16, #tpu.memory_space<vmem>>, %arg3: memref<32x32xbf16, #tpu.memory_space<vmem>>, %arg4: memref<32x32xbf16, #tpu.memory_space<vmem>>, %arg5: memref<1x32xf32, #tpu.memory_space<vmem>>, %arg6: memref<1x32xf32, #tpu.memory_space<vmem>>, %arg7: memref<1x32xf32, #tpu.memory_space<vmem>>, %arg8: memref<16x32xbf16, #tpu.memory_space<vmem>>, %arg9: memref<16x32xbf16, #tpu.memory_space<vmem>>, %arg10: memref<16x32xbf16, #tpu.memory_space<vmem>>) attributes {dimension_semantics = [#tpu.dimension_semantics<parallel>], iteration_bounds = array<i64: 1>, scalar_prefetch = 0 : i64, scratch_operands = 0 : i64, tpu.core_type = #tpu.core_type<tc>, window_params = [{transform_indices = @transform_0, window_bounds = array<i64: 16, 32>}, {pipeline_mode = #tpu.pipeline_mode<synchronous>, transform_indices = @transform_1, window_bounds = array<i64: 32, 32>}, {pipeline_mode = #tpu.pipeline_mode<synchronous>, transform_indices = @transform_2, window_bounds = array<i64: 32, 32>}, {pipeline_mode = #tpu.pipeline_mode<synchronous>, transform_indices = @transform_3, window_bounds = array<i64: 32, 32>}, {pipeline_mode = #tpu.pipeline_mode<synchronous>, transform_indices = @transform_4, window_bounds = array<i64: 1, 32>}, {pipeline_mode = #tpu.pipeline_mode<synchronous>, transform_indices = @transform_5, window_bounds = array<i64: 1, 32>}, {pipeline_mode = #tpu.pipeline_mode<synchronous>, transform_indices = @transform_6, window_bounds = array<i64: 1, 32>}, {transform_indices = @transform_7, window_bounds = array<i64: 16, 32>}, {transform_indices = @transform_8, window_bounds = array<i64: 16, 32>}, {transform_indices = @transform_9, window_bounds = array<i64: 16, 32>}]} {
    %c0 = arith.constant 0 : index
    %c0_0 = arith.constant 0 : index
    %0 = vector.load %arg1[%c0, %c0_0] : memref<16x32xf32, #tpu.memory_space<vmem>>, vector<16x32xf32>
    %1 = arith.truncf %0 : vector<16x32xf32> to vector<16x32xbf16>
    %c0_1 = arith.constant 0 : index
    %c0_2 = arith.constant 0 : index
    %2 = vector.load %arg2[%c0_1, %c0_2] : memref<32x32xbf16, #tpu.memory_space<vmem>>, vector<32x32xbf16>
    %cst = arith.constant dense<0.000000e+00> : vector<16x32xf32>
    %3 = tpu.matmul %1, %2, %cst {dimension_numbers = #tpu.dot_dimension_numbers<[1], [0], [0], [1], [0, 0, 1, 1], [], []>} : vector<16x32xbf16>, vector<32x32xbf16>, vector<16x32xf32> -> vector<16x32xf32>
    %c0_3 = arith.constant 0 : index
    %c0_4 = arith.constant 0 : index
    %4 = vector.load %arg5[%c0_3, %c0_4] : memref<1x32xf32, #tpu.memory_space<vmem>>, vector<1x32xf32>
    %5 = vector.broadcast %4 : vector<1x32xf32> to vector<16x32xf32>
    %6 = arith.addf %3, %5 : vector<16x32xf32>
    %c0_5 = arith.constant 0 : index
    %c0_6 = arith.constant 0 : index
    %7 = vector.load %arg3[%c0_5, %c0_6] : memref<32x32xbf16, #tpu.memory_space<vmem>>, vector<32x32xbf16>
    %cst_7 = arith.constant dense<0.000000e+00> : vector<16x32xf32>
    %8 = tpu.matmul %1, %7, %cst_7 {dimension_numbers = #tpu.dot_dimension_numbers<[1], [0], [0], [1], [0, 0, 1, 1], [], []>} : vector<16x32xbf16>, vector<32x32xbf16>, vector<16x32xf32> -> vector<16x32xf32>
    %c0_8 = arith.constant 0 : index
    %c0_9 = arith.constant 0 : index
    %9 = vector.load %arg6[%c0_8, %c0_9] : memref<1x32xf32, #tpu.memory_space<vmem>>, vector<1x32xf32>
    %10 = vector.broadcast %9 : vector<1x32xf32> to vector<16x32xf32>
    %11 = arith.addf %8, %10 : vector<16x32xf32>
    %c0_10 = arith.constant 0 : index
    %c0_11 = arith.constant 0 : index
    %12 = vector.load %arg4[%c0_10, %c0_11] : memref<32x32xbf16, #tpu.memory_space<vmem>>, vector<32x32xbf16>
    %cst_12 = arith.constant dense<0.000000e+00> : vector<16x32xf32>
    %13 = tpu.matmul %1, %12, %cst_12 {dimension_numbers = #tpu.dot_dimension_numbers<[1], [0], [0], [1], [0, 0, 1, 1], [], []>} : vector<16x32xbf16>, vector<32x32xbf16>, vector<16x32xf32> -> vector<16x32xf32>
    %c0_13 = arith.constant 0 : index
    %c0_14 = arith.constant 0 : index
    %14 = vector.load %arg7[%c0_13, %c0_14] : memref<1x32xf32, #tpu.memory_space<vmem>>, vector<1x32xf32>
    %15 = vector.broadcast %14 : vector<1x32xf32> to vector<16x32xf32>
    %16 = arith.addf %13, %15 : vector<16x32xf32>
    %17 = arith.truncf %6 : vector<16x32xf32> to vector<16x32xbf16>
    %c0_15 = arith.constant 0 : index
    %c0_16 = arith.constant 0 : index
    %18 = vector.load %arg8[%c0_15, %c0_16] : memref<16x32xbf16, #tpu.memory_space<vmem>>, vector<16x32xbf16>
    tpu.vector_store %arg8[%c0_15, %c0_16], %17 {strides = array<i32>} : memref<16x32xbf16, #tpu.memory_space<vmem>>, vector<16x32xbf16>,
    %19 = arith.truncf %11 : vector<16x32xf32> to vector<16x32xbf16>
    %c0_17 = arith.constant 0 : index
    %c0_18 = arith.constant 0 : index
    %20 = vector.load %arg9[%c0_17, %c0_18] : memref<16x32xbf16, #tpu.memory_space<vmem>>, vector<16x32xbf16>
    tpu.vector_store %arg9[%c0_17, %c0_18], %19 {strides = array<i32>} : memref<16x32xbf16, #tpu.memory_space<vmem>>, vector<16x32xbf16>,
    %21 = arith.truncf %16 : vector<16x32xf32> to vector<16x32xbf16>
    %c0_19 = arith.constant 0 : index
    %c0_20 = arith.constant 0 : index
    %22 = vector.load %arg10[%c0_19, %c0_20] : memref<16x32xbf16, #tpu.memory_space<vmem>>, vector<16x32xbf16>
    tpu.vector_store %arg10[%c0_19, %c0_20], %21 {strides = array<i32>} : memref<16x32xbf16, #tpu.memory_space<vmem>>, vector<16x32xbf16>,
    return
  }
  func.func @transform_0(%arg0: i32) -> (i32, i32) {
    %c0_i32 = arith.constant 0 : i32
    %c0_i32_0 = arith.constant 0 : i32
    return %arg0, %c0_i32 : i32, i32
  }
  func.func @transform_1(%arg0: i32) -> (i32, i32) {
    %c0_i32 = arith.constant 0 : i32
    %c0_i32_0 = arith.constant 0 : i32
    %c0_i32_1 = arith.constant 0 : i32
    return %c0_i32, %c0_i32_0 : i32, i32
  }
  func.func @transform_2(%arg0: i32) -> (i32, i32) {
    %c0_i32 = arith.constant 0 : i32
    %c0_i32_0 = arith.constant 0 : i32
    %c0_i32_1 = arith.constant 0 : i32
    return %c0_i32, %c0_i32_0 : i32, i32
  }
  func.func @transform_3(%arg0: i32) -> (i32, i32) {
    %c0_i32 = arith.constant 0 : i32
    %c0_i32_0 = arith.constant 0 : i32
    %c0_i32_1 = arith.constant 0 : i32
    return %c0_i32, %c0_i32_0 : i32, i32
  }
  func.func @transform_4(%arg0: i32) -> (i32, i32) {
    %c0_i32 = arith.constant 0 : i32
    %c0_i32_0 = arith.constant 0 : i32
    %c0_i32_1 = arith.constant 0 : i32
    return %c0_i32, %c0_i32_0 : i32, i32
  }
  func.func @transform_5(%arg0: i32) -> (i32, i32) {
    %c0_i32 = arith.constant 0 : i32
    %c0_i32_0 = arith.constant 0 : i32
    %c0_i32_1 = arith.constant 0 : i32
    return %c0_i32, %c0_i32_0 : i32, i32
  }
  func.func @transform_6(%arg0: i32) -> (i32, i32) {
    %c0_i32 = arith.constant 0 : i32
    %c0_i32_0 = arith.constant 0 : i32
    %c0_i32_1 = arith.constant 0 : i32
    return %c0_i32, %c0_i32_0 : i32, i32
  }
  func.func @transform_7(%arg0: i32) -> (i32, i32) {
    %c0_i32 = arith.constant 0 : i32
    %c0_i32_0 = arith.constant 0 : i32
    return %arg0, %c0_i32 : i32, i32
  }
  func.func @transform_8(%arg0: i32) -> (i32, i32) {
    %c0_i32 = arith.constant 0 : i32
    %c0_i32_0 = arith.constant 0 : i32
    return %arg0, %c0_i32 : i32, i32
  }
  func.func @transform_9(%arg0: i32) -> (i32, i32) {
    %c0_i32 = arith.constant 0 : i32
    %c0_i32_0 = arith.constant 0 : i32
    return %arg0, %c0_i32 : i32, i32
  }
}

module attributes {stable_mosaic.version = 11 : i64} {
  func.func @_linear_kernel(%arg0: i32, %arg1: memref<16x32xf32, #tpu.memory_space<vmem>>, %arg2: memref<32x32xbf16, #tpu.memory_space<vmem>>, %arg3: memref<1x32xf32, #tpu.memory_space<vmem>>, %arg4: memref<16x32xf32, #tpu.memory_space<vmem>>) attributes {dimension_semantics = [#tpu.dimension_semantics<parallel>], iteration_bounds = array<i64: 1>, scalar_prefetch = 0 : i64, scratch_operands = 0 : i64, tpu.core_type = #tpu.core_type<tc>, window_params = [{transform_indices = @transform_0, window_bounds = array<i64: 16, 32>}, {pipeline_mode = #tpu.pipeline_mode<synchronous>, transform_indices = @transform_1, window_bounds = array<i64: 32, 32>}, {pipeline_mode = #tpu.pipeline_mode<synchronous>, transform_indices = @transform_2, window_bounds = array<i64: 1, 32>}, {transform_indices = @transform_3, window_bounds = array<i64: 16, 32>}]} {
    %c0 = arith.constant 0 : index
    %c0_0 = arith.constant 0 : index
    %0 = vector.load %arg1[%c0, %c0_0] : memref<16x32xf32, #tpu.memory_space<vmem>>, vector<16x32xf32>
    %1 = arith.truncf %0 : vector<16x32xf32> to vector<16x32xbf16>
    %c0_1 = arith.constant 0 : index
    %c0_2 = arith.constant 0 : index
    %2 = vector.load %arg2[%c0_1, %c0_2] : memref<32x32xbf16, #tpu.memory_space<vmem>>, vector<32x32xbf16>
    %cst = arith.constant dense<0.000000e+00> : vector<16x32xf32>
    %3 = tpu.matmul %1, %2, %cst {dimension_numbers = #tpu.dot_dimension_numbers<[1], [0], [0], [1], [0, 0, 1, 1], [], []>} : vector<16x32xbf16>, vector<32x32xbf16>, vector<16x32xf32> -> vector<16x32xf32>
    %c0_3 = arith.constant 0 : index
    %c0_4 = arith.constant 0 : index
    %4 = vector.load %arg3[%c0_3, %c0_4] : memref<1x32xf32, #tpu.memory_space<vmem>>, vector<1x32xf32>
    %5 = vector.broadcast %4 : vector<1x32xf32> to vector<16x32xf32>
    %6 = arith.addf %3, %5 : vector<16x32xf32>
    %c0_5 = arith.constant 0 : index
    %c0_6 = arith.constant 0 : index
    %7 = vector.load %arg4[%c0_5, %c0_6] : memref<16x32xf32, #tpu.memory_space<vmem>>, vector<16x32xf32>
    tpu.vector_store %arg4[%c0_5, %c0_6], %6 {strides = array<i32>} : memref<16x32xf32, #tpu.memory_space<vmem>>, vector<16x32xf32>,
    return
  }
  func.func @transform_0(%arg0: i32) -> (i32, i32) {
    %c0_i32 = arith.constant 0 : i32
    %c0_i32_0 = arith.constant 0 : i32
    return %arg0, %c0_i32 : i32, i32
  }
  func.func @transform_1(%arg0: i32) -> (i32, i32) {
    %c0_i32 = arith.constant 0 : i32
    %c0_i32_0 = arith.constant 0 : i32
    %c0_i32_1 = arith.constant 0 : i32
    return %c0_i32, %c0_i32_0 : i32, i32
  }
  func.func @transform_2(%arg0: i32) -> (i32, i32) {
    %c0_i32 = arith.constant 0 : i32
    %c0_i32_0 = arith.constant 0 : i32
    %c0_i32_1 = arith.constant 0 : i32
    return %c0_i32, %c0_i32_0 : i32, i32
  }
  func.func @transform_3(%arg0: i32) -> (i32, i32) {
    %c0_i32 = arith.constant 0 : i32
    %c0_i32_0 = arith.constant 0 : i32
    return %arg0, %c0_i32 : i32, i32
  }
}

module attributes {stable_mosaic.version = 11 : i64} {
  func.func @_flash_attn_kernel(%arg0: i32, %arg1: i32, %arg2: i32, %arg3: memref<1x8x32xbf16, #tpu.memory_space<vmem>>, %arg4: memref<1x8x32xbf16, #tpu.memory_space<vmem>>, %arg5: memref<1x8x32xbf16, #tpu.memory_space<vmem>>, %arg6: memref<1x8x32xf32, #tpu.memory_space<vmem>>, %arg7: memref<8x32xf32, #tpu.memory_space<vmem>>, %arg8: memref<8x4xf32, #tpu.memory_space<vmem>>, %arg9: memref<8x4xf32, #tpu.memory_space<vmem>>) attributes {dimension_semantics = [#tpu.dimension_semantics<parallel>, #tpu.dimension_semantics<parallel>, #tpu.dimension_semantics<arbitrary>], iteration_bounds = array<i64: 2, 1, 1>, scalar_prefetch = 0 : i64, scratch_operands = 3 : i64, tpu.core_type = #tpu.core_type<tc>, window_params = [{transform_indices = @transform_0, window_bounds = array<i64: 1, 8, 32>}, {transform_indices = @transform_1, window_bounds = array<i64: 1, 8, 32>}, {transform_indices = @transform_2, window_bounds = array<i64: 1, 8, 32>}, {transform_indices = @transform_3, window_bounds = array<i64: 1, 8, 32>}]} {
    %c0_i32 = arith.constant 0 : i32
    %0 = arith.cmpi eq, %arg2, %c0_i32 : i32
    %1 = arith.extui %0 : i1 to i32
    %c0_i32_0 = arith.constant 0 : i32
    %2 = arith.cmpi ne, %1, %c0_i32_0 : i32
    scf.if %2 {
      %cst = arith.constant -1.000000e+30 : f32
      %9 = vector.broadcast %cst : f32 to vector<8x4xf32>
      %c0 = arith.constant 0 : index
      %c0_3 = arith.constant 0 : index
      %10 = vector.load %arg8[%c0, %c0_3] : memref<8x4xf32, #tpu.memory_space<vmem>>, vector<8x4xf32>
      tpu.vector_store %arg8[%c0, %c0_3], %9 {strides = array<i32>} : memref<8x4xf32, #tpu.memory_space<vmem>>, vector<8x4xf32>,
      %cst_4 = arith.constant 0.000000e+00 : f32
      %11 = vector.broadcast %cst_4 : f32 to vector<8x4xf32>
      %c0_5 = arith.constant 0 : index
      %c0_6 = arith.constant 0 : index
      %12 = vector.load %arg9[%c0_5, %c0_6] : memref<8x4xf32, #tpu.memory_space<vmem>>, vector<8x4xf32>
      tpu.vector_store %arg9[%c0_5, %c0_6], %11 {strides = array<i32>} : memref<8x4xf32, #tpu.memory_space<vmem>>, vector<8x4xf32>,
      %cst_7 = arith.constant 0.000000e+00 : f32
      %13 = vector.broadcast %cst_7 : f32 to vector<8x32xf32>
      %c0_8 = arith.constant 0 : index
      %c0_9 = arith.constant 0 : index
      %14 = vector.load %arg7[%c0_8, %c0_9] : memref<8x32xf32, #tpu.memory_space<vmem>>, vector<8x32xf32>
      tpu.vector_store %arg7[%c0_8, %c0_9], %13 {strides = array<i32>} : memref<8x32xf32, #tpu.memory_space<vmem>>, vector<8x32xf32>,
    } else {
    }
    %3 = arith.cmpi sle, %arg2, %arg1 : i32
    %4 = arith.extui %3 : i1 to i32
    %c0_i32_1 = arith.constant 0 : i32
    %5 = arith.cmpi ne, %4, %c0_i32_1 : i32
    scf.if %5 {
      %c0 = arith.constant 0 : index
      %c0_3 = arith.constant 0 : index
      %c0_4 = arith.constant 0 : index
      %9 = vector.load %arg3[%c0, %c0_3, %c0_4] : memref<1x8x32xbf16, #tpu.memory_space<vmem>>, vector<1x8x32xbf16>
      %10 = vector.shape_cast %9 : vector<1x8x32xbf16> to vector<8x32xbf16>
      %c0_5 = arith.constant 0 : index
      %c0_6 = arith.constant 0 : index
      %c0_7 = arith.constant 0 : index
      %11 = vector.load %arg4[%c0_5, %c0_6, %c0_7] : memref<1x8x32xbf16, #tpu.memory_space<vmem>>, vector<1x8x32xbf16>
      %12 = vector.shape_cast %11 : vector<1x8x32xbf16> to vector<8x32xbf16>
      %c0_8 = arith.constant 0 : index
      %c0_9 = arith.constant 0 : index
      %c0_10 = arith.constant 0 : index
      %13 = vector.load %arg5[%c0_8, %c0_9, %c0_10] : memref<1x8x32xbf16, #tpu.memory_space<vmem>>, vector<1x8x32xbf16>
      %14 = vector.shape_cast %13 : vector<1x8x32xbf16> to vector<8x32xbf16>
      %c8_i32 = arith.constant 8 : i32
      %15 = arith.muli %arg1, %c8_i32 : i32
      %16 = tpu.iota {dimensions = array<i32: 0>} : vector<8x8xi32>
      %17 = vector.broadcast %15 : i32 to vector<8x8xi32>
      %18 = arith.addi %17, %16 : vector<8x8xi32>
      %c8_i32_11 = arith.constant 8 : i32
      %19 = arith.muli %arg2, %c8_i32_11 : i32
      %20 = tpu.iota {dimensions = array<i32: 1>} : vector<8x8xi32>
      %21 = vector.broadcast %19 : i32 to vector<8x8xi32>
      %22 = arith.addi %21, %20 : vector<8x8xi32>
      %23 = arith.cmpi sle, %22, %18 : vector<8x8xi32>
      %24 = vector.extract_strided_slice %10 {offsets = [0, 0], sizes = [8, 8], strides = [1, 1]} : vector<8x32xbf16> to vector<8x8xbf16>
      %25 = vector.extract_strided_slice %12 {offsets = [0, 0], sizes = [8, 8], strides = [1, 1]} : vector<8x32xbf16> to vector<8x8xbf16>
      %cst = arith.constant dense<0.000000e+00> : vector<8x8xf32>
      %26 = tpu.matmul %24, %25, %cst {dimension_numbers = #tpu.dot_dimension_numbers<[1], [1], [0], [0], [0, 0, 1, 0], [], []>} : vector<8x8xbf16>, vector<8x8xbf16>, vector<8x8xf32> -> vector<8x8xf32>
      %cst_12 = arith.constant -1.000000e+30 : f32
      %27 = vector.broadcast %cst_12 : f32 to vector<8x8xf32>
      %28 = arith.select %23, %26, %27 : vector<8x8xi1>, vector<8x8xf32>
      %c0_13 = arith.constant 0 : index
      %c0_14 = arith.constant 0 : index
      %29 = vector.load %arg8[%c0_13, %c0_14] : memref<8x4xf32, #tpu.memory_space<vmem>>, vector<8x1xf32>
      %c0_15 = arith.constant 0 : index
      %c0_16 = arith.constant 0 : index
      %30 = vector.load %arg9[%c0_15, %c0_16] : memref<8x4xf32, #tpu.memory_space<vmem>>, vector<8x1xf32>
      %cst_17 = arith.constant dense<0xFF800000> : vector<8xf32>
      %31 = vector.multi_reduction <maximumf>, %28, %cst_17 [1] : vector<8x8xf32> to vector<8xf32>
      %32 = vector.shape_cast %31 : vector<8xf32> to vector<8x1xf32>
      %33 = arith.maximumf %29, %32 : vector<8x1xf32>
      %34 = arith.subf %29, %33 : vector<8x1xf32>
      %35 = math.exp %34 : vector<8x1xf32>
      %36 = vector.broadcast %33 : vector<8x1xf32> to vector<8x8xf32>
      %37 = arith.subf %28, %36 : vector<8x8xf32>
      %38 = math.exp %37 : vector<8x8xf32>
      %39 = arith.mulf %35, %30 : vector<8x1xf32>
      %cst_18 = arith.constant dense<0.000000e+00> : vector<8xf32>
      %40 = vector.multi_reduction <add>, %38, %cst_18 [1] : vector<8x8xf32> to vector<8xf32>
      %41 = vector.shape_cast %40 : vector<8xf32> to vector<8x1xf32>
      %42 = arith.addf %39, %41 : vector<8x1xf32>
      %c0_19 = arith.constant 0 : index
      %c0_20 = arith.constant 0 : index
      %43 = vector.load %arg9[%c0_19, %c0_20] : memref<8x4xf32, #tpu.memory_space<vmem>>, vector<8x1xf32>
      tpu.vector_store %arg9[%c0_19, %c0_20], %42 {strides = array<i32>} : memref<8x4xf32, #tpu.memory_space<vmem>>, vector<8x1xf32>,
      %c0_21 = arith.constant 0 : index
      %c0_22 = arith.constant 0 : index
      %44 = vector.load %arg8[%c0_21, %c0_22] : memref<8x4xf32, #tpu.memory_space<vmem>>, vector<8x1xf32>
      tpu.vector_store %arg8[%c0_21, %c0_22], %33 {strides = array<i32>} : memref<8x4xf32, #tpu.memory_space<vmem>>, vector<8x1xf32>,
      %c0_23 = arith.constant 0 : index
      %c0_24 = arith.constant 0 : index
      %45 = vector.load %arg7[%c0_23, %c0_24] : memref<8x32xf32, #tpu.memory_space<vmem>>, vector<8x8xf32>
      %46 = vector.broadcast %35 : vector<8x1xf32> to vector<8x8xf32>
      %47 = arith.mulf %46, %45 : vector<8x8xf32>
      %48 = arith.truncf %38 : vector<8x8xf32> to vector<8x8xbf16>
      %49 = vector.extract_strided_slice %14 {offsets = [0, 0], sizes = [8, 8], strides = [1, 1]} : vector<8x32xbf16> to vector<8x8xbf16>
      %cst_25 = arith.constant dense<0.000000e+00> : vector<8x8xf32>
      %50 = tpu.matmul %48, %49, %cst_25 {dimension_numbers = #tpu.dot_dimension_numbers<[1], [0], [0], [1], [0, 0, 1, 1], [], []>} : vector<8x8xbf16>, vector<8x8xbf16>, vector<8x8xf32> -> vector<8x8xf32>
      %51 = arith.addf %47, %50 : vector<8x8xf32>
      %c0_26 = arith.constant 0 : index
      %c0_27 = arith.constant 0 : index
      %52 = vector.load %arg7[%c0_26, %c0_27] : memref<8x32xf32, #tpu.memory_space<vmem>>, vector<8x8xf32>
      tpu.vector_store %arg7[%c0_26, %c0_27], %51 {strides = array<i32>} : memref<8x32xf32, #tpu.memory_space<vmem>>, vector<8x8xf32>,
      %53 = vector.extract_strided_slice %10 {offsets = [0, 8], sizes = [8, 8], strides = [1, 1]} : vector<8x32xbf16> to vector<8x8xbf16>
      %54 = vector.extract_strided_slice %12 {offsets = [0, 8], sizes = [8, 8], strides = [1, 1]} : vector<8x32xbf16> to vector<8x8xbf16>
      %cst_28 = arith.constant dense<0.000000e+00> : vector<8x8xf32>
      %55 = tpu.matmul %53, %54, %cst_28 {dimension_numbers = #tpu.dot_dimension_numbers<[1], [1], [0], [0], [0, 0, 1, 0], [], []>} : vector<8x8xbf16>, vector<8x8xbf16>, vector<8x8xf32> -> vector<8x8xf32>
      %cst_29 = arith.constant -1.000000e+30 : f32
      %56 = vector.broadcast %cst_29 : f32 to vector<8x8xf32>
      %57 = arith.select %23, %55, %56 : vector<8x8xi1>, vector<8x8xf32>
      %c0_30 = arith.constant 0 : index
      %c1 = arith.constant 1 : index
      %58 = vector.load %arg8[%c0_30, %c1] : memref<8x4xf32, #tpu.memory_space<vmem>>, vector<8x1xf32>
      %c0_31 = arith.constant 0 : index
      %c1_32 = arith.constant 1 : index
      %59 = vector.load %arg9[%c0_31, %c1_32] : memref<8x4xf32, #tpu.memory_space<vmem>>, vector<8x1xf32>
      %cst_33 = arith.constant dense<0xFF800000> : vector<8xf32>
      %60 = vector.multi_reduction <maximumf>, %57, %cst_33 [1] : vector<8x8xf32> to vector<8xf32>
      %61 = vector.shape_cast %60 : vector<8xf32> to vector<8x1xf32>
      %62 = arith.maximumf %58, %61 : vector<8x1xf32>
      %63 = arith.subf %58, %62 : vector<8x1xf32>
      %64 = math.exp %63 : vector<8x1xf32>
      %65 = vector.broadcast %62 : vector<8x1xf32> to vector<8x8xf32>
      %66 = arith.subf %57, %65 : vector<8x8xf32>
      %67 = math.exp %66 : vector<8x8xf32>
      %68 = arith.mulf %64, %59 : vector<8x1xf32>
      %cst_34 = arith.constant dense<0.000000e+00> : vector<8xf32>
      %69 = vector.multi_reduction <add>, %67, %cst_34 [1] : vector<8x8xf32> to vector<8xf32>
      %70 = vector.shape_cast %69 : vector<8xf32> to vector<8x1xf32>
      %71 = arith.addf %68, %70 : vector<8x1xf32>
      %c0_35 = arith.constant 0 : index
      %c1_36 = arith.constant 1 : index
      %72 = vector.load %arg9[%c0_35, %c1_36] : memref<8x4xf32, #tpu.memory_space<vmem>>, vector<8x1xf32>
      tpu.vector_store %arg9[%c0_35, %c1_36], %71 {strides = array<i32>} : memref<8x4xf32, #tpu.memory_space<vmem>>, vector<8x1xf32>,
      %c0_37 = arith.constant 0 : index
      %c1_38 = arith.constant 1 : index
      %73 = vector.load %arg8[%c0_37, %c1_38] : memref<8x4xf32, #tpu.memory_space<vmem>>, vector<8x1xf32>
      tpu.vector_store %arg8[%c0_37, %c1_38], %62 {strides = array<i32>} : memref<8x4xf32, #tpu.memory_space<vmem>>, vector<8x1xf32>,
      %c0_39 = arith.constant 0 : index
      %c8 = arith.constant 8 : index
      %74 = vector.load %arg7[%c0_39, %c8] : memref<8x32xf32, #tpu.memory_space<vmem>>, vector<8x8xf32>
      %75 = vector.broadcast %64 : vector<8x1xf32> to vector<8x8xf32>
      %76 = arith.mulf %75, %74 : vector<8x8xf32>
      %77 = arith.truncf %67 : vector<8x8xf32> to vector<8x8xbf16>
      %78 = vector.extract_strided_slice %14 {offsets = [0, 8], sizes = [8, 8], strides = [1, 1]} : vector<8x32xbf16> to vector<8x8xbf16>
      %cst_40 = arith.constant dense<0.000000e+00> : vector<8x8xf32>
      %79 = tpu.matmul %77, %78, %cst_40 {dimension_numbers = #tpu.dot_dimension_numbers<[1], [0], [0], [1], [0, 0, 1, 1], [], []>} : vector<8x8xbf16>, vector<8x8xbf16>, vector<8x8xf32> -> vector<8x8xf32>
      %80 = arith.addf %76, %79 : vector<8x8xf32>
      %c0_41 = arith.constant 0 : index
      %c8_42 = arith.constant 8 : index
      %81 = vector.load %arg7[%c0_41, %c8_42] : memref<8x32xf32, #tpu.memory_space<vmem>>, vector<8x8xf32>
      tpu.vector_store %arg7[%c0_41, %c8_42], %80 {strides = array<i32>} : memref<8x32xf32, #tpu.memory_space<vmem>>, vector<8x8xf32>,
      %82 = vector.extract_strided_slice %10 {offsets = [0, 16], sizes = [8, 8], strides = [1, 1]} : vector<8x32xbf16> to vector<8x8xbf16>
      %83 = vector.extract_strided_slice %12 {offsets = [0, 16], sizes = [8, 8], strides = [1, 1]} : vector<8x32xbf16> to vector<8x8xbf16>
      %cst_43 = arith.constant dense<0.000000e+00> : vector<8x8xf32>
      %84 = tpu.matmul %82, %83, %cst_43 {dimension_numbers = #tpu.dot_dimension_numbers<[1], [1], [0], [0], [0, 0, 1, 0], [], []>} : vector<8x8xbf16>, vector<8x8xbf16>, vector<8x8xf32> -> vector<8x8xf32>
      %cst_44 = arith.constant -1.000000e+30 : f32
      %85 = vector.broadcast %cst_44 : f32 to vector<8x8xf32>
      %86 = arith.select %23, %84, %85 : vector<8x8xi1>, vector<8x8xf32>
      %c0_45 = arith.constant 0 : index
      %c2 = arith.constant 2 : index
      %87 = vector.load %arg8[%c0_45, %c2] : memref<8x4xf32, #tpu.memory_space<vmem>>, vector<8x1xf32>
      %c0_46 = arith.constant 0 : index
      %c2_47 = arith.constant 2 : index
      %88 = vector.load %arg9[%c0_46, %c2_47] : memref<8x4xf32, #tpu.memory_space<vmem>>, vector<8x1xf32>
      %cst_48 = arith.constant dense<0xFF800000> : vector<8xf32>
      %89 = vector.multi_reduction <maximumf>, %86, %cst_48 [1] : vector<8x8xf32> to vector<8xf32>
      %90 = vector.shape_cast %89 : vector<8xf32> to vector<8x1xf32>
      %91 = arith.maximumf %87, %90 : vector<8x1xf32>
      %92 = arith.subf %87, %91 : vector<8x1xf32>
      %93 = math.exp %92 : vector<8x1xf32>
      %94 = vector.broadcast %91 : vector<8x1xf32> to vector<8x8xf32>
      %95 = arith.subf %86, %94 : vector<8x8xf32>
      %96 = math.exp %95 : vector<8x8xf32>
      %97 = arith.mulf %93, %88 : vector<8x1xf32>
      %cst_49 = arith.constant dense<0.000000e+00> : vector<8xf32>
      %98 = vector.multi_reduction <add>, %96, %cst_49 [1] : vector<8x8xf32> to vector<8xf32>
      %99 = vector.shape_cast %98 : vector<8xf32> to vector<8x1xf32>
      %100 = arith.addf %97, %99 : vector<8x1xf32>
      %c0_50 = arith.constant 0 : index
      %c2_51 = arith.constant 2 : index
      %101 = vector.load %arg9[%c0_50, %c2_51] : memref<8x4xf32, #tpu.memory_space<vmem>>, vector<8x1xf32>
      tpu.vector_store %arg9[%c0_50, %c2_51], %100 {strides = array<i32>} : memref<8x4xf32, #tpu.memory_space<vmem>>, vector<8x1xf32>,
      %c0_52 = arith.constant 0 : index
      %c2_53 = arith.constant 2 : index
      %102 = vector.load %arg8[%c0_52, %c2_53] : memref<8x4xf32, #tpu.memory_space<vmem>>, vector<8x1xf32>
      tpu.vector_store %arg8[%c0_52, %c2_53], %91 {strides = array<i32>} : memref<8x4xf32, #tpu.memory_space<vmem>>, vector<8x1xf32>,
      %c0_54 = arith.constant 0 : index
      %c16 = arith.constant 16 : index
      %103 = vector.load %arg7[%c0_54, %c16] : memref<8x32xf32, #tpu.memory_space<vmem>>, vector<8x8xf32>
      %104 = vector.broadcast %93 : vector<8x1xf32> to vector<8x8xf32>
      %105 = arith.mulf %104, %103 : vector<8x8xf32>
      %106 = arith.truncf %96 : vector<8x8xf32> to vector<8x8xbf16>
      %107 = vector.extract_strided_slice %14 {offsets = [0, 16], sizes = [8, 8], strides = [1, 1]} : vector<8x32xbf16> to vector<8x8xbf16>
      %cst_55 = arith.constant dense<0.000000e+00> : vector<8x8xf32>
      %108 = tpu.matmul %106, %107, %cst_55 {dimension_numbers = #tpu.dot_dimension_numbers<[1], [0], [0], [1], [0, 0, 1, 1], [], []>} : vector<8x8xbf16>, vector<8x8xbf16>, vector<8x8xf32> -> vector<8x8xf32>
      %109 = arith.addf %105, %108 : vector<8x8xf32>
      %c0_56 = arith.constant 0 : index
      %c16_57 = arith.constant 16 : index
      %110 = vector.load %arg7[%c0_56, %c16_57] : memref<8x32xf32, #tpu.memory_space<vmem>>, vector<8x8xf32>
      tpu.vector_store %arg7[%c0_56, %c16_57], %109 {strides = array<i32>} : memref<8x32xf32, #tpu.memory_space<vmem>>, vector<8x8xf32>,
      %111 = vector.extract_strided_slice %10 {offsets = [0, 24], sizes = [8, 8], strides = [1, 1]} : vector<8x32xbf16> to vector<8x8xbf16>
      %112 = vector.extract_strided_slice %12 {offsets = [0, 24], sizes = [8, 8], strides = [1, 1]} : vector<8x32xbf16> to vector<8x8xbf16>
      %cst_58 = arith.constant dense<0.000000e+00> : vector<8x8xf32>
      %113 = tpu.matmul %111, %112, %cst_58 {dimension_numbers = #tpu.dot_dimension_numbers<[1], [1], [0], [0], [0, 0, 1, 0], [], []>} : vector<8x8xbf16>, vector<8x8xbf16>, vector<8x8xf32> -> vector<8x8xf32>
      %cst_59 = arith.constant -1.000000e+30 : f32
      %114 = vector.broadcast %cst_59 : f32 to vector<8x8xf32>
      %115 = arith.select %23, %113, %114 : vector<8x8xi1>, vector<8x8xf32>
      %c0_60 = arith.constant 0 : index
      %c3 = arith.constant 3 : index
      %116 = vector.load %arg8[%c0_60, %c3] : memref<8x4xf32, #tpu.memory_space<vmem>>, vector<8x1xf32>
      %c0_61 = arith.constant 0 : index
      %c3_62 = arith.constant 3 : index
      %117 = vector.load %arg9[%c0_61, %c3_62] : memref<8x4xf32, #tpu.memory_space<vmem>>, vector<8x1xf32>
      %cst_63 = arith.constant dense<0xFF800000> : vector<8xf32>
      %118 = vector.multi_reduction <maximumf>, %115, %cst_63 [1] : vector<8x8xf32> to vector<8xf32>
      %119 = vector.shape_cast %118 : vector<8xf32> to vector<8x1xf32>
      %120 = arith.maximumf %116, %119 : vector<8x1xf32>
      %121 = arith.subf %116, %120 : vector<8x1xf32>
      %122 = math.exp %121 : vector<8x1xf32>
      %123 = vector.broadcast %120 : vector<8x1xf32> to vector<8x8xf32>
      %124 = arith.subf %115, %123 : vector<8x8xf32>
      %125 = math.exp %124 : vector<8x8xf32>
      %126 = arith.mulf %122, %117 : vector<8x1xf32>
      %cst_64 = arith.constant dense<0.000000e+00> : vector<8xf32>
      %127 = vector.multi_reduction <add>, %125, %cst_64 [1] : vector<8x8xf32> to vector<8xf32>
      %128 = vector.shape_cast %127 : vector<8xf32> to vector<8x1xf32>
      %129 = arith.addf %126, %128 : vector<8x1xf32>
      %c0_65 = arith.constant 0 : index
      %c3_66 = arith.constant 3 : index
      %130 = vector.load %arg9[%c0_65, %c3_66] : memref<8x4xf32, #tpu.memory_space<vmem>>, vector<8x1xf32>
      tpu.vector_store %arg9[%c0_65, %c3_66], %129 {strides = array<i32>} : memref<8x4xf32, #tpu.memory_space<vmem>>, vector<8x1xf32>,
      %c0_67 = arith.constant 0 : index
      %c3_68 = arith.constant 3 : index
      %131 = vector.load %arg8[%c0_67, %c3_68] : memref<8x4xf32, #tpu.memory_space<vmem>>, vector<8x1xf32>
      tpu.vector_store %arg8[%c0_67, %c3_68], %120 {strides = array<i32>} : memref<8x4xf32, #tpu.memory_space<vmem>>, vector<8x1xf32>,
      %c0_69 = arith.constant 0 : index
      %c24 = arith.constant 24 : index
      %132 = vector.load %arg7[%c0_69, %c24] : memref<8x32xf32, #tpu.memory_space<vmem>>, vector<8x8xf32>
      %133 = vector.broadcast %122 : vector<8x1xf32> to vector<8x8xf32>
      %134 = arith.mulf %133, %132 : vector<8x8xf32>
      %135 = arith.truncf %125 : vector<8x8xf32> to vector<8x8xbf16>
      %136 = vector.extract_strided_slice %14 {offsets = [0, 24], sizes = [8, 8], strides = [1, 1]} : vector<8x32xbf16> to vector<8x8xbf16>
      %cst_70 = arith.constant dense<0.000000e+00> : vector<8x8xf32>
      %137 = tpu.matmul %135, %136, %cst_70 {dimension_numbers = #tpu.dot_dimension_numbers<[1], [0], [0], [1], [0, 0, 1, 1], [], []>} : vector<8x8xbf16>, vector<8x8xbf16>, vector<8x8xf32> -> vector<8x8xf32>
      %138 = arith.addf %134, %137 : vector<8x8xf32>
      %c0_71 = arith.constant 0 : index
      %c24_72 = arith.constant 24 : index
      %139 = vector.load %arg7[%c0_71, %c24_72] : memref<8x32xf32, #tpu.memory_space<vmem>>, vector<8x8xf32>
      tpu.vector_store %arg7[%c0_71, %c24_72], %138 {strides = array<i32>} : memref<8x32xf32, #tpu.memory_space<vmem>>, vector<8x8xf32>,
    } else {
    }
    %6 = arith.cmpi eq, %arg2, %arg1 : i32
    %7 = arith.extui %6 : i1 to i32
    %c0_i32_2 = arith.constant 0 : i32
    %8 = arith.cmpi ne, %7, %c0_i32_2 : i32
    scf.if %8 {
      %c0 = arith.constant 0 : index
      %c0_3 = arith.constant 0 : index
      %9 = vector.load %arg9[%c0, %c0_3] : memref<8x4xf32, #tpu.memory_space<vmem>>, vector<8x4xf32>
      %10 = tpu.reciprocal %9 {approx = true} : vector<8x4xf32> -> vector<8x4xf32>
      %c0_4 = arith.constant 0 : index
      %c0_5 = arith.constant 0 : index
      %11 = vector.load %arg7[%c0_4, %c0_5] : memref<8x32xf32, #tpu.memory_space<vmem>>, vector<8x8xf32>
      %12 = vector.extract_strided_slice %10 {offsets = [0, 0], sizes = [8, 1], strides = [1, 1]} : vector<8x4xf32> to vector<8x1xf32>
      %13 = vector.broadcast %12 : vector<8x1xf32> to vector<8x8xf32>
      %14 = arith.mulf %11, %13 : vector<8x8xf32>
      %c0_6 = arith.constant 0 : index
      %c8 = arith.constant 8 : index
      %15 = vector.load %arg7[%c0_6, %c8] : memref<8x32xf32, #tpu.memory_space<vmem>>, vector<8x8xf32>
      %16 = vector.extract_strided_slice %10 {offsets = [0, 1], sizes = [8, 1], strides = [1, 1]} : vector<8x4xf32> to vector<8x1xf32>
      %17 = vector.broadcast %16 : vector<8x1xf32> to vector<8x8xf32>
      %18 = arith.mulf %15, %17 : vector<8x8xf32>
      %c0_7 = arith.constant 0 : index
      %c16 = arith.constant 16 : index
      %19 = vector.load %arg7[%c0_7, %c16] : memref<8x32xf32, #tpu.memory_space<vmem>>, vector<8x8xf32>
      %20 = vector.extract_strided_slice %10 {offsets = [0, 2], sizes = [8, 1], strides = [1, 1]} : vector<8x4xf32> to vector<8x1xf32>
      %21 = vector.broadcast %20 : vector<8x1xf32> to vector<8x8xf32>
      %22 = arith.mulf %19, %21 : vector<8x8xf32>
      %c0_8 = arith.constant 0 : index
      %c24 = arith.constant 24 : index
      %23 = vector.load %arg7[%c0_8, %c24] : memref<8x32xf32, #tpu.memory_space<vmem>>, vector<8x8xf32>
      %24 = vector.extract_strided_slice %10 {offsets = [0, 3], sizes = [8, 1], strides = [1, 1]} : vector<8x4xf32> to vector<8x1xf32>
      %25 = vector.broadcast %24 : vector<8x1xf32> to vector<8x8xf32>
      %26 = arith.mulf %23, %25 : vector<8x8xf32>
      %27 = tpu.concatenate %14, %18, %22, %26 in 1 : vector<8x8xf32>, vector<8x8xf32>, vector<8x8xf32>, vector<8x8xf32> -> vector<8x32xf32>
      %c0_9 = arith.constant 0 : index
      %c0_10 = arith.constant 0 : index
      %c0_11 = arith.constant 0 : index
      %28 = vector.load %arg6[%c0_9, %c0_10, %c0_11] : memref<1x8x32xf32, #tpu.memory_space<vmem>>, vector<1x8x32xf32>
      %29 = vector.shape_cast %28 : vector<1x8x32xf32> to vector<8x32xf32>
      %30 = vector.shape_cast %27 : vector<8x32xf32> to vector<1x8x32xf32>
      tpu.vector_store %arg6[%c0_9, %c0_10, %c0_11], %30 {strides = array<i32>} : memref<1x8x32xf32, #tpu.memory_space<vmem>>, vector<1x8x32xf32>,
    } else {
    }
    return
  }
  func.func @transform_0(%arg0: i32, %arg1: i32, %arg2: i32) -> (i32, i32, i32) {
    %c0_i32 = arith.constant 0 : i32
    %c0_i32_0 = arith.constant 0 : i32
    return %arg0, %arg1, %c0_i32 : i32, i32, i32
  }
  func.func @transform_1(%arg0: i32, %arg1: i32, %arg2: i32) -> (i32, i32, i32) {
    %0 = arith.minsi %arg2, %arg1 : i32
    %c0_i32 = arith.constant 0 : i32
    %c0_i32_0 = arith.constant 0 : i32
    return %arg0, %0, %c0_i32 : i32, i32, i32
  }
  func.func @transform_2(%arg0: i32, %arg1: i32, %arg2: i32) -> (i32, i32, i32) {
    %0 = arith.minsi %arg2, %arg1 : i32
    %c0_i32 = arith.constant 0 : i32
    %c0_i32_0 = arith.constant 0 : i32
    return %arg0, %0, %c0_i32 : i32, i32, i32
  }
  func.func @transform_3(%arg0: i32, %arg1: i32, %arg2: i32) -> (i32, i32, i32) {
    %c0_i32 = arith.constant 0 : i32
    %c0_i32_0 = arith.constant 0 : i32
    return %arg0, %arg1, %c0_i32 : i32, i32, i32
  }
}

</mosaic_0001>

<bundles_post_ra>
// kernel: _lambda_.5
= control target key start
LH: loop header
LB: loop body
LE: loop exit
PB: predicated region body
PF: predicated region fallthrough
CT: control target
= control target key end

     0   :  { %v151_v1 = vmov 0.0   ;;  %vm152_vm0 = vmmov 0   ;;  %s203_s0 = inlined_call_operand.vmem [shape: f32[16,32], index: 0, kind: input, shape index: {}]   ;;  %s204_s1 = inlined_call_operand.vmem [shape: bf16[32,32], index: 1, kind: input, shape index: {}]   ;;  %s205_s2 = inlined_call_operand.vmem [shape: f32[1,32], index: 2, kind: input, shape index: {}]   ;;  %s206_s3 = inlined_call_operand.hbm [shape: f32[16,32], index: 3, kind: output, shape index: {}]  }
   0x1   :  { %v125_v0 = vld [vmem:[%s204_s1] sm:$0xff]   ;;  %112 = vmatprep.subr.bf16.mxu0 %v151_v1  ;;  %v126_v2 = vld [vmem:[%s204_s1 + $0x8] sm:$0xff]   ;;  %116 = vmatprep.mubr.msk.bf16.mxu0 %vm152_vm0, %v151_v1 }
   0x2   :  { %113 = vmatpush3.bf16.msra.mxu0 %v125_v0  ;;  %v16_v3 = vld [vmem:[%s203_s0] sm:$0xff]  ;;  %v17_v4 = vld [vmem:[%s203_s0 + $0x8] sm:$0xff] }
   0x3   :  { %114 = vmatprep.subr.bf16.mxu0 %v151_v1 }
   0x4   :  { %8 = vsyncpa [#allocation3], 0  ;;  %v18_v5 = vpack.c.bf16 %v17_v4, %v16_v3  ;;  %vm42_vm1 = vcmask 261120   ;;  %v105_v6 = vld [vmem:[%s205_s2] ss:$0 sm:$0xff]  ;;  %s153_s1 = smov [#allocation2]  }
   0x5   :  { %s94_s22 = sshll.u32 %s153_s1, 4  ;;  %s95_s22 = int_to_ptr.vmem [resolvable:$true] %s94_s22 }
   0x6   :  { %115 = vmatpush3.bf16.msra.mxu0 %v126_v2  ;;  %s127_s0 = scalar_lea.vmem %s95_s22, 256  ;;  %p132_p1 = scmp.lt.s32.totalorder %s95_s22, %s95_s22 }
   0x7   :  { %p128_p0 = scmp.ne.s32.totalorder %s95_s22, %s127_s0  ;;  %p133_p2 = scmp.lt.s32.totalorder %s127_s0, %s127_s0 }
   0x9   :  { %117 = vmatmul.mubr.msk.bf16.vlgmr.msra.gmra.mrb[0].mxu0 %vm42_vm1, %v18_v5  ;;  %p134_p3 = por %p133_p2, %p132_p1 }
   0xb   :  { %p135_p4 = pnand %p134_p3, %p128_p0 }
  0xdc   :  { %v80_v7 = vpop.f32.mrb[0].mxu0 }
  0xdd   :  { %v81_v8 = vadd.f32 %v105_v6, %v80_v7  ;;  %v118_v9 = vpop.f32.mrb[1].mxu0 }
  0xde   :  { %v83_v10 = vpop.f32.mrb[2].mxu0 }
  0xdf   :  { %87 = vst.msk [vmem:[#allocation2] sm:$0xff] %vm42_vm1, %v81_v8  ;;  %v84_v11 = vadd.f32 %v105_v6, %v83_v10  ;;  %v119_v12 = vpop.f32.mrb[3].mxu0 }
  0xe1   :  { %88 = vst.msk [vmem:[#allocation2 + $0x8] sm:$0xff] %vm42_vm1, %v84_v11 }
  0xe2   :  { %138 = shalt.err (!%p135_p4)
}
  0xe3   :  { %s139_s24 = scalar_lea.hbm %s206_s3, 256 }
  0xe4   :  { %p140_p5 = scmp.ne.s32.totalorder %s206_s3, %s139_s24  ;;  %p143_p6 = scmp.lt.u32.totalorder %s139_s24, %s206_s3 }
  0xe6   :  { %p145_p7 = pnand %p143_p6, %p140_p5 }
  0xe8   :  { %148 = shalt.err (!%p145_p7)
}
  0xe9   :  { %s154_s29 = smov 128   ;;  %s155_s30 = smov 8  }
  0xea   :  { %100 = dma.vmem_to_hbm [thread:$0]  %s95_s22, 256, %s206_s3, [#allocation3], %s154_s29, %s154_s29, %s155_s30  }
  0xeb   :  { %149 = dma.done.wait [#allocation3], 256  }
  0xec   :  { %150 = vsyncadd [#allocation3], 4294967040 }
  0xed   :  { %104 = vsyncpa [#allocation3], 1 }

// kernel: _lambda_.3
= control target key start
LH: loop header
LB: loop body
LE: loop exit
PB: predicated region body
PF: predicated region fallthrough
CT: control target
= control target key end

     0   :  { %15 = vsyncpa [#allocation3], 0  ;;  %s598_s0 = inlined_call_operand.vmem [shape: f32[16,32], index: 0, kind: input, shape index: {}]   ;;  %s599_s1 = inlined_call_operand.hbm [shape: bf16[32,32], index: 1, kind: input, shape index: {}]   ;;  %s600_s2 = inlined_call_operand.hbm [shape: bf16[32,32], index: 2, kind: input, shape index: {}]   ;;  %s601_s3 = inlined_call_operand.vmem [shape: bf16[32,32], index: 3, kind: input, shape index: {}]   ;;  %s602_s4 = inlined_call_operand.hbm [shape: f32[1,32], index: 4, kind: input, shape index: {}]   ;;  %s603_s5 = inlined_call_operand.vmem [shape: f32[1,32], index: 5, kind: input, shape index: {}]   ;;  %s604_s6 = inlined_call_operand.vmem [shape: f32[1,32], index: 6, kind: input, shape index: {}]   ;;  %s605_s7 = inlined_call_operand.vmem [shape: bf16[16,32], index: 7, kind: output, shape index: {0}]   ;;  %s606_s8 = inlined_call_operand.vmem [shape: bf16[16,32], index: 8, kind: output, shape index: {1}]   ;;  %s607_s9 = inlined_call_operand.vmem [shape: bf16[16,32], index: 9, kind: output, shape index: {2}]  }
   0x1   :  { %16 = vsyncpa [#allocation5], 0  ;;  %s453_s30 = smov [#allocation4]   ;;  %s454_s11 = smov [#allocation2]  }
   0x2   :  { %s36_s10 = sshll.u32 %s453_s30, 4  ;;  %s24_s12 = sshll.u32 %s454_s11, 4  ;;  %s37_s10 = int_to_ptr.vmem [resolvable:$true] %s36_s10  ;;  %s510_s12 = int_to_ptr.vmem [resolvable:$true] %s24_s12 }
   0x3   :  { %s383_s15 = scalar_lea.hbm %s600_s2, 256 }
   0x4   :  { %p384_p0 = scmp.ne.s32.totalorder %s600_s2, %s383_s15  ;;  %p387_p1 = scmp.lt.u32.totalorder %s383_s15, %s600_s2 }
   0x6   :  { %p389_p2 = pnand %p387_p1, %p384_p0 }
   0x8   :  { %392 = shalt.err (!%p389_p2)
}
   0x9   :  { %s393_s20 = scalar_lea.vmem %s37_s10, 256  ;;  %p398_p4 = scmp.lt.s32.totalorder %s37_s10, %s37_s10 }
   0xa   :  { %p394_p3 = scmp.ne.s32.totalorder %s37_s10, %s393_s20  ;;  %p399_p5 = scmp.lt.s32.totalorder %s393_s20, %s393_s20 }
   0xc   :  { %p400_p6 = por %p399_p5, %p398_p4 }
   0xe   :  { %p401_p7 = pnand %p400_p6, %p394_p3 }
  0x10   :  { %404 = shalt.err (!%p401_p7)
}
  0x11   :  { %s455_s21 = smov 64   ;;  %s456_s22 = smov 4  }
  0x12   :  { %42 = dma.hbm_to_vmem [thread:$0]  %s600_s2, 256, %s37_s10, [#allocation5], %s455_s21, %s455_s21, %s456_s22  }
  0x13   :  { %s405_s27 = scalar_lea.hbm %s599_s1, 256 }
  0x14   :  { %p406_p8 = scmp.ne.s32.totalorder %s599_s1, %s405_s27  ;;  %p409_p9 = scmp.lt.u32.totalorder %s405_s27, %s599_s1 }
  0x16   :  { %p411_p10 = pnand %p409_p9, %p406_p8 }
  0x18   :  { %414 = shalt.err (!%p411_p10)
}
  0x19   :  { %s415_s13 = scalar_lea.vmem %s510_s12, 256  ;;  %p420_p12 = scmp.lt.s32.totalorder %s510_s12, %s510_s12 }
  0x1a   :  { %p416_p11 = scmp.ne.s32.totalorder %s510_s12, %s415_s13  ;;  %p421_p13 = scmp.lt.s32.totalorder %s415_s13, %s415_s13 }
  0x1c   :  { %p422_p0 = por %p421_p13, %p420_p12 }
  0x1e   :  { %p423_p1 = pnand %p422_p0, %p416_p11 }
  0x20   :  { %426 = shalt.err (!%p423_p1)
}
  0x21   :  { %30 = dma.hbm_to_vmem [thread:$0]  %s599_s1, 256, %s510_s12, [#allocation3], %s455_s21, %s455_s21, %s456_s22  }
  0x22   :  { %s457_s14 = smov [#allocation6]   ;;  %s427_s18 = scalar_lea.hbm %s602_s4, 16 }
  0x23   :  { %s51_s15 = sshll.u32 %s457_s14, 4  ;;  %p428_p2 = scmp.ne.s32.totalorder %s602_s4, %s427_s18  ;;  %s52_s15 = int_to_ptr.vmem [resolvable:$true] %s51_s15 }
  0x24   :  { %p431_p3 = scmp.lt.u32.totalorder %s427_s18, %s602_s4 }
  0x26   :  { %p433_p4 = pnand %p431_p3, %p428_p2 }
  0x28   :  { %436 = shalt.err (!%p433_p4)
}
  0x29   :  { %s437_s25 = scalar_lea.vmem %s52_s15, 16  ;;  %s441_s1 = scalar_lea.vmem %s52_s15, 32 }
  0x2a   :  { %p438_p5 = scmp.ne.s32.totalorder %s52_s15, %s437_s25  ;;  %p442_p6 = scmp.lt.s32.totalorder %s52_s15, %s52_s15 }
  0x2b   :  { %p443_p7 = scmp.lt.s32.totalorder %s441_s1, %s437_s25 }
  0x2d   :  { %p444_p8 = por %p443_p7, %p442_p6 }
  0x2f   :  { %p445_p9 = pnand %p444_p8, %p438_p5 }
  0x31   :  { %448 = shalt.err (!%p445_p9)
}
  0x32   :  { %54 = dma.hbm_to_vmem [thread:$0]  %s602_s4, 16, %s52_s15, [#allocation5]  }
  0x33   :  { %449 = dma.done.wait [#allocation3], 256  }
  0x34   :  { %450 = vsyncadd [#allocation3], 4294967040 }
  0x35   :  { %451 = dma.done.wait [#allocation5], 272  }
  0x36   :  { %452 = vsyncadd [#allocation5], 4294967024  ;;  %v458_v0 = vmov 0.0   ;;  %vm459_vm0 = vmmov 0   ;;  %v377_v1 = vld [vmem:[#allocation2] sm:$0xff]   ;;  %v378_v2 = vld [vmem:[#allocation2 + $0x8] sm:$0xff]  }
  0x37   :  { %346 = vmatprep.subr.bf16.mxu0 %v458_v0  ;;  %354 = vmatprep.subr.bf16.mxu1 %v458_v0  ;;  %v379_v3 = vld [vmem:[#allocation4] sm:$0xff]   ;;  %v69_v4 = vld [vmem:[%s598_s0] sm:$0xff]  ;;  %v70_v5 = vld [vmem:[%s598_s0 + $0x8] sm:$0xff]  ;;  %vm95_vm1 = vcmask 261120   ;;  %vm276_vm2 = vcmask 257024  }
  0x38   :  { %350 = vmatprep.mubr.msk.bf16.mxu0 %vm459_vm0, %v458_v0  ;;  %358 = vmatprep.mubr.msk.bf16.mxu1 %vm459_vm0, %v458_v0  ;;  %v71_v6 = vpack.c.bf16 %v70_v5, %v69_v4  ;;  %v381_v7 = vld [vmem:[#allocation4 + $0x8] sm:$0xff]   ;;  %v380_v8 = vld [vmem:[%s601_s3] sm:$0xff]   ;;  %v382_v9 = vld [vmem:[%s601_s3 + $0x8] sm:$0xff]  }
  0x39   :  { %347 = vmatpush3.bf16.msra.mxu0 %v377_v1  ;;  %355 = vmatpush3.bf16.msra.mxu1 %v379_v3  ;;  %v313_v10 = vld [vmem:[#allocation6] ss:$0 sm:$0xff] }
  0x3a   :  { %348 = vmatprep.subr.bf16.mxu0 %v458_v0  ;;  %356 = vmatprep.subr.bf16.mxu1 %v458_v0  ;;  %v317_v12 = vld [vmem:[%s603_s5] ss:$0 sm:$0xff] }
  0x3b   :  { %v321_v27 = vld [vmem:[%s604_s6] ss:$0 sm:$0xff] }
  0x3d   :  { %349 = vmatpush3.bf16.msra.mxu0 %v378_v2  ;;  %357 = vmatpush3.bf16.msra.mxu1 %v381_v7 }
  0x3e   :  { %362 = vmatprep.subr.bf16.mxu0 %v458_v0 }
  0x40   :  { %351 = vmatmul.mubr.msk.bf16.vlgmr.msra.gmra.mrb[0].mxu0 %vm95_vm1, %v71_v6  ;;  %359 = vmatmul.mubr.msk.bf16.vlgmr.msra.gmra.mrb[0].mxu1 %vm95_vm1, %v71_v6 }
  0x41   :  { %363 = vmatpush3.bf16.msra.mxu0 %v380_v8  ;;  %366 = vmatprep.mubr.msk.bf16.mxu0 %vm459_vm0, %v458_v0 }
  0x42   :  { %364 = vmatprep.subr.bf16.mxu0 %v458_v0 }
  0x45   :  { %365 = vmatpush3.bf16.msra.mxu0 %v382_v9 }
  0x48   :  { %367 = vmatmul.mubr.msk.bf16.vlgmr.msra.gmra.mrb[4].mxu0 %vm95_vm1, %v71_v6 }
 0x113   :  { %v133_v11 = vpop.f32.mrb[0].mxu0  ;;  %v197_v16 = vpop.f32.mrb[0].mxu1 }
 0x114   :  { %v134_v13 = vadd.f32 %v313_v10, %v133_v11  ;;  %v352_v14 = vpop.f32.mrb[1].mxu0  ;;  %v198_v20 = vadd.f32 %v317_v12, %v197_v16  ;;  %v360_v21 = vpop.f32.mrb[1].mxu1 }
 0x115   :  { %v136_v15 = vpop.f32.mrb[2].mxu0  ;;  %v200_v22 = vpop.f32.mrb[2].mxu1 }
 0x116   :  { %v331_v17 = vpack.c.bf16 %v134_v13, %v134_v13  ;;  %v137_v18 = vadd.f32 %v313_v10, %v136_v15  ;;  %v353_v19 = vpop.f32.mrb[3].mxu0  ;;  %v333_v24 = vpack.c.bf16 %v198_v20, %v198_v20  ;;  %v201_v25 = vadd.f32 %v317_v12, %v200_v22  ;;  %v361_v26 = vpop.f32.mrb[3].mxu1 }
 0x118   :  { %277 = vst.msk [vmem:[%s605_s7] sm:$0xf] %vm276_vm2, %v331_v17  ;;  %v332_v23 = vpack.c.bf16 %v137_v18, %v137_v18  ;;  %287 = vst.msk [vmem:[%s606_s8] sm:$0xf] %vm276_vm2, %v333_v24  ;;  %v334_v28 = vpack.c.bf16 %v201_v25, %v201_v25 }
 0x11a   :  { %278 = vst.msk [vmem:[%s605_s7 + $0x4] sm:$0xf] %vm276_vm2, %v332_v23  ;;  %288 = vst.msk [vmem:[%s606_s8 + $0x4] sm:$0xf] %vm276_vm2, %v334_v28 }
 0x11b   :  { %v261_v29 = vpop.f32.mrb[4].mxu0 }
 0x11c   :  { %v262_v30 = vadd.f32 %v321_v27, %v261_v29  ;;  %v368_v31 = vpop.f32.mrb[5].mxu0 }
 0x11d   :  { %v264_v32 = vpop.f32.mrb[6].mxu0 }
 0x11e   :  { %v335_v33 = vpack.c.bf16 %v262_v30, %v262_v30  ;;  %v265_v34 = vadd.f32 %v321_v27, %v264_v32  ;;  %v369_v35 = vpop.f32.mrb[7].mxu0 }
 0x120   :  { %297 = vst.msk [vmem:[%s607_s9] sm:$0xf] %vm276_vm2, %v335_v33  ;;  %v336_v36 = vpack.c.bf16 %v265_v34, %v265_v34 }
 0x122   :  { %298 = vst.msk [vmem:[%s607_s9 + $0x4] sm:$0xf] %vm276_vm2, %v336_v36 }
 0x123   :  { %311 = vsyncpa [#allocation3], 1 }
 0x124   :  { %312 = vsyncpa [#allocation5], 1 }

// kernel: _lambda_.4
= control target key start
LH: loop header
LB: loop body
LE: loop exit
PB: predicated region body
PF: predicated region fallthrough
CT: control target
= control target key end

     0   :  { %s1228_s12 = smov 0   ;;  %s1230_s13 = smov 0   ;;  %s1435_s0 = inlined_call_operand.vmem [shape: bf16[2,8,32], index: 0, kind: input, shape index: {}]   ;;  %s1436_s1 = inlined_call_operand.vmem [shape: bf16[2,8,32], index: 1, kind: input, shape index: {}]   ;;  %s1437_s2 = inlined_call_operand.vmem [shape: bf16[2,8,32], index: 2, kind: input, shape index: {}]   ;;  %s1438_s3 = inlined_call_operand.vmem [shape: f32[2,8,32], index: 3, kind: output, shape index: {}]  }
   0x1   :  { %s1232_s14 = smov 0  }
   0x2 LB: > { %s32_s15 = sadd.s32 1, %s1189_s13  ;;  %p1019_p0 = scmp.ge.s32.totalorder %s1193_s14, 1  ;;  %s1193_s14 = sphi %s1232_s14, %s13_s14   ;;  %s1189_s13 = sphi %s1230_s13, %s1440_s13   ;;  %s1185_s12 = sphi %s1228_s12, %s1439_s12  }
   0x3   : > { %p34_p1 = scmp.ge.s32.totalorder %s32_s15, 2  ;;  %p206_p2 = scmp.lt.s32.totalorder %s1193_s14, 3 }
   0x5   : > { %s1442_s15 = smov (%p34_p1, %s32_s15), 0  ;;  %p207_p3 = pnand %p1019_p0, %p206_p2 }
   0x6   : > { %p252_p4 = scmp.lt.s32.totalorder (!%p207_p3), %s1185_s12, 1  ;;  %v1195_v0 = vmov (!%p207_p3), 0.0   ;;  %vm1196_vm0 = vmmov (!%p207_p3), 0   ;;  %vm316_vm1 = vcmask (!%p207_p3), 64512   ;;  %vm293_vm2 = vcmask (!%p207_p3), 31744   ;;  %s1199_s23 = smov (!%p207_p3), 120  }
   0x7   : > { %210 = sbr.rel (%p207_p3) target bundleno = 1415 (0x587), region = 32  ;;  %1053 = vmatprep.subr.bf16.mxu0 (!%p207_p3), %v1195_v0  ;;  %1055 = vmatprep.mubr.msk.bf16.mxu0 (!%p207_p3), %vm1196_vm0, %v1195_v0  ;;  %v1197_v4 = vmov (!%p207_p3), -1e+30   ;;  %295 = vst.msk [vmem:[#allocation4] sm:$0xff] (!%p207_p3), %vm293_vm2, %v1195_v0  ;;  %v306_v5 = vlaneseq (!%p207_p3)  ;;  %v1198_v14 = vmov (!%p207_p3), 0   ;;  %s1200_s24 = smov (!%p207_p3), 112  }
   0x8   : > { %1059 = vmatprep.subr.bf16.mxu1 (!%p207_p3), %v1195_v0  ;;  %1061 = vmatprep.mubr.msk.bf16.mxu1 (!%p207_p3), %vm1196_vm0, %v1195_v0  ;;  %294 = vst.msk [vmem:[#allocation3] sm:$0xff] (!%p207_p3), %vm293_vm2, %v1197_v4  ;;  %s1201_s25 = smov (!%p207_p3), 104   ;;  %vm386_vm4 = vcmask (!%p207_p3), 7168   ;;  %vm400_vm5 = vcmask (!%p207_p3), 1043456   ;;  %v1202_v58 = vmov (!%p207_p3), 1   ;;  %v1203_v60 = vmov (!%p207_p3), 2  }
   0x9   : > { %v1271_v6 = vshrl.u32 (!%p207_p3), %v306_v5, 7  ;;  %v1273_v7 = vand.u32 (!%p207_p3), 127, %v306_v5  ;;  %1138 = vset.pattern.permute.xlu0 (!%p207_p3), %v1198_v14  ;;  %1139 = vset.pattern.permute.xlu1 (!%p207_p3), %v1202_v58  ;;  %vm525_vm6 = vcmask (!%p207_p3), 15368   ;;  %v1204_v4 = vmov (!%p207_p3), 3   ;;  %s1205_s29 = smov (!%p207_p3), 8   ;;  %s1206_s30 = smov (!%p207_p3), 16  }
   0xa   : > { %vm296_vm7 = vcmask (!%p207_p3), 261120   ;;  %vm667_vm8 = vcmask (!%p207_p3), 23568   ;;  %vm806_vm9 = vcmask (!%p207_p3), 31768   ;;  %s1207_s4 = smov (!%p207_p3), 24   ;;  %vm592_vm10 = vcmask (!%p207_p3), 130112  }
   0xb   : > { %vm315_vm3 = vcmp.le.s32.totalorder (!%p207_p3), %v1273_v7, %v1271_v6  ;;  %297 = vst.msk [vmem:[#allocation2] sm:$0xff] (!%p207_p3), %vm296_vm7, %v1195_v0  ;;  %vm731_vm11 = vcmask (!%p207_p3), 195712   ;;  %vm870_vm12 = vcmask (!%p207_p3), 261312   ;;  %vm902_vm13 = vcmask (!%p207_p3), 130048  }
   0xc   : > { %vm904_vm14 = vcmask (!%p207_p3), 195584  }
   0xe   : > { %s1444_s12 = smov (!%p252_p4, %s1185_s12), 1 }
   0xf   : > { %s1255_s16 = sshll.u32 %s1444_s12, 2  ;;  %v1288_v17 = vld [vmem:[#allocation3] sm:$0xff]  ;;  %s1023_s5 = sshll.u32 %s1444_s12, 3 }
  0x10   : > { %s267_s19 = scalar_lea.vmem %s1436_s1, %s1255_s16  ;;  %s258_s22 = scalar_lea.vmem %s1435_s0, %s1255_s16 }
  0x11   : > { %v303_v1 = vld [vmem:[%s267_s19] sm:$0xf]  ;;  %s278_s28 = scalar_lea.vmem %s1437_s2, %s1255_s16  ;;  %s287_s8 = scalar_lea.vmem %s1438_s3, %s1023_s5 }
  0x12   : > { %v321_v2 = vsel %vm316_vm1, %v303_v1, 0  ;;  %v302_v3 = vld [vmem:[%s258_s22] sm:$0xf]  ;;  %v1027_v15 = vcombine.low %v303_v1, %v303_v1 }
  0x13   : > { %1054 = vmatpush3.bf16.xpose.msra.mxu0 %v321_v2  ;;  %v1026_v16 = vcombine.low %v302_v3, %v302_v3  ;;  %v1302_v21 = vld [vmem:[%s278_s28] sm:$0xf] }
  0x14   : > { %1071 = vmatprep.subr.bf16.mxu0 %v1195_v0  ;;  %454 = vrot.lane.b32.xlu1 %v1027_v15, %s1199_s23  ;;  %v402_v22 = vsel %vm400_vm5, %v1302_v21, 0  ;;  %v1029_v2 = vcombine.low %v1302_v21, %v1302_v21 }
  0x15   : > { %1060 = vmatpush3.bf16.msra.mxu1 %v402_v22 }
  0x16   : > { %1065 = vmatprep.subr.bf16.mxu1 %v1195_v0 }
  0x18   : > { %449 = vrot.lane.b32.xlu1 %v1026_v16, %s1199_s23 }
  0x1a   : > { %1056 = vmatmul.mubr.msk.bf16.vlgmr.msra.gmra.mrb[0].mxu0 %vm316_vm1, %v302_v3 }
  0x1b   : > { %1073 = vmatprep.mubr.msk.bf16.mxu0 %vm1196_vm0, %v1195_v0 }
  0x1c   : > { %596 = vrot.lane.b32.xlu1 %v1027_v15, %s1200_s24 }
  0x20   : > { %594 = vrot.lane.b32.xlu1 %v1026_v16, %s1200_s24 }
  0x24   : > { %735 = vrot.lane.b32.xlu1 %v1027_v15, %s1201_s25 }
  0x28   : > { %733 = vrot.lane.b32.xlu1 %v1026_v16, %s1201_s25 }
  0x86   : > { %v455_v26 = vpop.permute.xlu1 %454 }
  0x87   : > { %v460_v29 = vsel %vm316_vm1, %v455_v26, 0  ;;  %v389_v26 = vld [vmem:[#allocation2] sm:$0xff] }
  0x8a   : > { %v450_v27 = vpop.permute.xlu1 %449 }
  0x8e   : > { %v597_v31 = vpop.permute.xlu1 %596 }
  0x8f   : > { %v602_v33 = vsel %vm316_vm1, %v597_v31, 0 }
  0x92   : > { %v595_v32 = vpop.permute.xlu1 %594 }
  0x96   : > { %v736_v34 = vpop.permute.xlu1 %735 }
  0x97   : > { %v741_v35 = vsel %vm316_vm1, %v736_v34, 0 }
  0x9a   : > { %v734_v36 = vpop.permute.xlu1 %733 }
  0xed   : > { %v357_v8 = vpop.f32.mrb[0].mxu0 }
  0xee   : > { %v363_v9 = vsel %vm315_vm3, %v357_v8, -1e+30  ;;  %v1057_v10 = vpop.f32.mrb[1].mxu0 }
  0xef   : > { %v360_v11 = vpop.f32.mrb[2].mxu0  ;;  %v366_v12 = vsel %vm316_vm1, %v363_v9, -inf }
  0xf0   : > { %367 = vmax.xlane.f32.xlu0 %v366_v12  ;;  %v1058_v13 = vpop.f32.mrb[3].mxu0 }
 0x17d   : > { %v368_v18 = vpop.xlane.xlu0 %367 }
 0x17e   : > { %v1291_v19 = vmax.f32 %v1288_v17, %v368_v18 }
 0x180   : > { %v370_v20 = vsub.f32 %v1288_v17, %v1291_v19  ;;  %388 = vst.msk [vmem:[#allocation3] sm:$0xff] %vm386_vm4, %v1291_v19  ;;  %375 = vperm.xlu0 %1138, %v1291_v19  }
 0x182   : > { %v371_v1 = vmul.f32 1.442695, %v370_v20 }
 0x184   : > { %1140 = vset.pattern.permute.xlu0 %v1203_v60 }
 0x187   : > { %v503_v62 = vld [vmem:[#allocation3] sm:$0xff] }
 0x1ff   : > { %v376_v23 = vpop.permute.xlu0 %375 }
 0x200   : > { %v378_v24 = vsub.f32 %v363_v9, %v376_v23 }
 0x202   : > { %v379_v25 = vmul.f32 1.442695, %v378_v24 }
 0x204   : > { %1153 = vpow2.f32 %v379_v25 }
 0x205   : > { %1155 = vpow2.f32 %v371_v1 }
 0x20e   : > { %v1307_v28 = vpop.eup %1153 }
 0x20f   : > { %v396_v30 = vpack.c.bf16 %v1307_v28, %v1307_v28  ;;  %v1366_v9 = vpop.eup %1155  ;;  %v382_v15 = vsel %vm316_vm1, %v1307_v28, 0.0 }
 0x211   : > { %1062 = vmatmul.mubr.msk.bf16.vlgmr.msra.gmra.mrb[0].mxu1 %vm316_vm1, %v396_v30 }
 0x212   : > { %1066 = vmatpush3.bf16.xpose.msra.mxu1 %v460_v29  ;;  %1067 = vmatprep.mubr.msk.bf16.mxu1 %vm1196_vm0, %v1195_v0 }
 0x213   : > { %1077 = vmatprep.subr.bf16.mxu1 %v1195_v0 }
 0x219   : > { %1068 = vmatmul.mubr.msk.bf16.vlgmr.msra.gmra.mrb[4].mxu1 %vm316_vm1, %v450_v27 }
 0x21a   : > { %1078 = vmatpush3.bf16.xpose.msra.mxu1 %v602_v33  ;;  %1079 = vmatprep.mubr.msk.bf16.mxu1 %vm1196_vm0, %v1195_v0 }
 0x21b   : > { %1089 = vmatprep.subr.bf16.mxu1 %v1195_v0 }
 0x221   : > { %1080 = vmatmul.mubr.msk.bf16.vlgmr.msra.gmra.mrb[8].mxu1 %vm316_vm1, %v595_v32 }
 0x222   : > { %1090 = vmatpush3.bf16.xpose.msra.mxu1 %v741_v35  ;;  %1091 = vmatprep.mubr.msk.bf16.mxu1 %vm1196_vm0, %v1195_v0 }
 0x229   : > { %1092 = vmatmul.mubr.msk.bf16.vlgmr.msra.gmra.mrb[12].mxu1 %vm316_vm1, %v734_v36 }
 0x2e4   : > { %v1326_v37 = vpop.f32.mrb[0].mxu1 }
 0x2e5   : > { %v1063_v38 = vpop.f32.mrb[1].mxu1 }
 0x2e6   : > { %v441_v39 = vpop.f32.mrb[2].mxu1 }
 0x2e7   : > { %v1064_v40 = vpop.f32.mrb[3].mxu1 }
 0x2ec   : > { %v496_v41 = vpop.f32.mrb[4].mxu1 }
 0x2ed   : > { %v1331_v42 = vsel %vm315_vm3, %v496_v41, -1e+30  ;;  %v1069_v43 = vpop.f32.mrb[5].mxu1 }
 0x2ee   : > { %v499_v44 = vpop.f32.mrb[6].mxu1  ;;  %v505_v45 = vsel %vm316_vm1, %v1331_v42, -inf }
 0x2ef   : > { %506 = vmax.xlane.f32.xlu1 %v505_v45  ;;  %v1070_v46 = vpop.f32.mrb[7].mxu1 }
 0x2f4   : > { %v638_v47 = vpop.f32.mrb[8].mxu1 }
 0x2f5   : > { %v1338_v48 = vsel %vm315_vm3, %v638_v47, -1e+30  ;;  %v1081_v49 = vpop.f32.mrb[9].mxu1 }
 0x2f6   : > { %v641_v50 = vpop.f32.mrb[10].mxu1  ;;  %v647_v51 = vsel %vm316_vm1, %v1338_v48, -inf }
 0x2f7   : > { %648 = vmax.xlane.f32.xlu0 %v647_v51  ;;  %v1082_v52 = vpop.f32.mrb[11].mxu1 }
 0x2fc   : > { %v777_v53 = vpop.f32.mrb[12].mxu1 }
 0x2fd   : > { %v1345_v54 = vsel %vm315_vm3, %v777_v53, -1e+30  ;;  %v1093_v55 = vpop.f32.mrb[13].mxu1 }
 0x2fe   : > { %v780_v56 = vpop.f32.mrb[14].mxu1  ;;  %v786_v57 = vsel %vm316_vm1, %v1345_v54, -inf }
 0x2ff   : > { %v1094_v59 = vpop.f32.mrb[15].mxu1  ;;  %787 = vmax.xlane.f32.xlu1 %v786_v57 }
 0x37c   : > { %v507_v61 = vpop.xlane.xlu1 %506 }
 0x37d   : > { %v508_v63 = vmax.f32 %v503_v62, %v507_v61 }
 0x37f   : > { %v509_v3 = vsub.f32 %v503_v62, %v508_v63  ;;  %527 = vst.msk [vmem:[#allocation3] sm:$0xff] %vm525_vm6, %v508_v63  ;;  %514 = vperm.xlu1 %1139, %v508_v63  }
 0x381   : > { %v510_v16 = vmul.f32 1.442695, %v509_v3 }
 0x383   : > { %539 = vrot.lane.b32.xlu1 %v1029_v2, %s1199_s23  ;;  %1157 = vpow2.f32 %v510_v16 }
 0x384   : > { %1141 = vset.pattern.permute.xlu1 %v1204_v4  ;;  %v649_v5 = vpop.xlane.xlu0 %648 }
 0x386   : > { %v1359_v6 = vld [vmem:[#allocation3] sm:$0xff] }
 0x387   : > { %v650_v7 = vmax.f32 %v1359_v6, %v649_v5 }
 0x389   : > { %v651_v8 = vsub.f32 %v1359_v6, %v650_v7  ;;  %669 = vst.msk [vmem:[#allocation3] sm:$0xff] %vm667_vm8, %v650_v7  ;;  %656 = vperm.xlu0 %1140, %v650_v7  }
 0x38c   : > { %v788_v10 = vpop.xlane.xlu1 %787 }
 0x38d   : > { %1142 = vset.pattern.permute.xlu0 %v1198_v14  ;;  %v1158_v17 = vpop.eup %1157 }
 0x38e   : > { %392 = vperm.xlu0 %1142, %v1366_v9  }
 0x390   : > { %v1370_v11 = vld [vmem:[#allocation3] sm:$0xff] }
 0x391   : > { %v1373_v12 = vmax.f32 %v1370_v11, %v788_v10 }
 0x392   : > { %1145 = vset.pattern.permute.xlu0 %v1204_v4 }
 0x393   : > { %v790_v13 = vsub.f32 %v1370_v11, %v1373_v12  ;;  %808 = vst.msk [vmem:[#allocation3] sm:$0xff] %vm806_vm9, %v1373_v12  ;;  %795 = vperm.xlu1 %1141, %v1373_v12  }
 0x395   : > { %v791_v55 = vmul.f32 1.442695, %v790_v13 }
 0x397   : > { %678 = vrot.lane.b32.xlu1 %v1029_v2, %s1200_s24 }
 0x398   : > { %1143 = vset.pattern.permute.xlu1 %v1202_v58 }
 0x39b   : > { %817 = vrot.lane.b32.xlu1 %v1029_v2, %s1201_s25 }
 0x3bf   : > { %383 = vadd.xlane.f32.xlu1 %v382_v15 }
 0x3d0   : > { %531 = vperm.xlu1 %1143, %v1158_v17  }
 0x3d4   : > { %1144 = vset.pattern.permute.xlu1 %v1203_v60 }
 0x3fe   : > { %v515_v18 = vpop.permute.xlu1 %514 }
 0x3ff   : > { %v517_v19 = vsub.f32 %v1331_v42, %v515_v18  ;;  %v652_v42 = vmul.f32 1.442695, %v651_v8 }
 0x401   : > { %v518_v20 = vmul.f32 1.442695, %v517_v19 }
 0x402   : > { %v540_v21 = vpop.permute.xlu1 %539 }
 0x403   : > { %1159 = vpow2.f32 %v518_v20  ;;  %v545_v22 = vsel %vm400_vm5, %v540_v21, 0 }
 0x404   : > { %1072 = vmatpush3.bf16.msra.mxu0 %v545_v22 }
 0x405   : > { %1083 = vmatprep.subr.bf16.mxu0 %v1195_v0 }
 0x408   : > { %v657_v23 = vpop.permute.xlu0 %656 }
 0x409   : > { %v659_v24 = vsub.f32 %v1338_v48, %v657_v23  ;;  %v365_v48 = vld [vmem:[#allocation4] sm:$0xff] }
 0x40a   : > { %v381_v49 = vmul.f32 %v1366_v9, %v365_v48 }
 0x40b   : > { %v660_v25 = vmul.f32 1.442695, %v659_v24 }
 0x40d   : > { %v1160_v27 = vpop.eup %1159  ;;  %1161 = vpow2.f32 %v660_v25  ;;  %v393_v28 = vpop.permute.xlu0 %392 }
 0x40e   : > { %v395_v29 = vmul.f32 %v393_v28, %v389_v26  ;;  %v521_v30 = vsel %vm316_vm1, %v1160_v27, 0.0  ;;  %v535_v31 = vpack.c.bf16 %v1160_v27, %v1160_v27 }
 0x40f   : > { %522 = vadd.xlane.f32.xlu0 %v521_v30 }
 0x410   : > { %v444_v32 = vadd.f32 %v1326_v37, %v395_v29  ;;  %1074 = vmatmul.mubr.msk.bf16.vlgmr.msra.gmra.mrb[4].mxu0 %vm316_vm1, %v535_v31 }
 0x411   : > { %1085 = vmatprep.mubr.msk.bf16.mxu0 %vm1196_vm0, %v1195_v0 }
 0x412   : > { %445 = vst.msk [vmem:[#allocation2] sm:$0xff] %vm316_vm1, %v444_v32  ;;  %v796_v33 = vpop.permute.xlu1 %795 }
 0x413   : > { %v798_v34 = vsub.f32 %v1345_v54, %v796_v33 }
 0x415   : > { %v799_v35 = vmul.f32 1.442695, %v798_v34 }
 0x416   : > { %v679_v36 = vpop.permute.xlu1 %678 }
 0x417   : > { %v1162_v38 = vpop.eup %1161  ;;  %1163 = vpow2.f32 %v799_v35  ;;  %v684_v39 = vsel %vm400_vm5, %v679_v36, 0 }
 0x418   : > { %1084 = vmatpush3.bf16.msra.mxu0 %v684_v39  ;;  %v663_v40 = vsel %vm316_vm1, %v1162_v38, 0.0  ;;  %v677_v37 = vpack.c.bf16 %v1162_v38, %v1162_v38  ;;  %1165 = vpow2.f32 %v652_v42 }
 0x419   : > { %664 = vadd.xlane.f32.xlu1 %v663_v40  ;;  %1095 = vmatprep.subr.bf16.mxu0 %v1195_v0  ;;  %1167 = vpow2.f32 %v791_v55  ;;  %v528_v19 = vld [vmem:[#allocation2] sm:$0xff] }
 0x41a   : > { %v818_v41 = vpop.permute.xlu1 %817 }
 0x41b   : > { %1086 = vmatmul.mubr.msk.bf16.vlgmr.msra.gmra.mrb[8].mxu0 %vm316_vm1, %v677_v37  ;;  %v823_v43 = vsel %vm400_vm5, %v818_v41, 0 }
 0x41c   : > { %1096 = vmatpush3.bf16.msra.mxu0 %v823_v43  ;;  %1097 = vmatprep.mubr.msk.bf16.mxu0 %vm1196_vm0, %v1195_v0 }
 0x421   : > { %v1164_v44 = vpop.eup %1163 }
 0x422   : > { %v802_v45 = vsel %vm316_vm1, %v1164_v44, 0.0  ;;  %v816_v46 = vpack.c.bf16 %v1164_v44, %v1164_v44  ;;  %v1166_v47 = vpop.eup %1165 }
 0x423   : > { %803 = vadd.xlane.f32.xlu0 %v802_v45  ;;  %v1168_v62 = vpop.eup %1167 }
 0x424   : > { %1098 = vmatmul.mubr.msk.bf16.vlgmr.msra.gmra.mrb[12].mxu0 %vm316_vm1, %v816_v46 }
 0x42a   : > { %673 = vperm.xlu1 %1144, %v1166_v47  }
 0x42e   : > { %1146 = vset.pattern.permute.xlu1 %v1198_v14 }
 0x44c   : > { %v384_v50 = vpop.xlane.xlu1 %383 }
 0x44d   : > { %v385_v51 = vadd.f32 %v384_v50, %v381_v49 }
 0x44f   : > { %387 = vst.msk [vmem:[#allocation4] sm:$0xff] %vm386_vm4, %v385_v51 }
 0x450   : > { %v532_v56 = vpop.permute.xlu1 %531 }
 0x451   : > { %v534_v20 = vmul.f32 %v532_v56, %v528_v19 }
 0x456   : > { %v504_v0 = vld [vmem:[#allocation4] sm:$0xff] }
 0x457   : > { %v520_v52 = vmul.f32 %v1158_v17, %v504_v0 }
 0x49c   : > { %v523_v53 = vpop.xlane.xlu0 %522 }
 0x49d   : > { %v524_v54 = vadd.f32 %v523_v53, %v520_v52 }
 0x49f   : > { %526 = vst.msk [vmem:[#allocation4] sm:$0xff] %vm525_vm6, %v524_v54 }
 0x4a6   : > { %v646_v57 = vld [vmem:[#allocation4] sm:$0xff]  ;;  %v665_v59 = vpop.xlane.xlu1 %664 }
 0x4a7   : > { %v662_v14 = vmul.f32 %v1166_v47, %v646_v57 }
 0x4a9   : > { %v666_v61 = vadd.f32 %v665_v59, %v662_v14 }
 0x4aa   : > { %v674_v23 = vpop.permute.xlu1 %673 }
 0x4ab   : > { %668 = vst.msk [vmem:[#allocation4] sm:$0xff] %vm667_vm8, %v666_v61 }
 0x4b0   : > { %v804_v2 = vpop.xlane.xlu0 %803 }
 0x4b2   : > { %v785_v63 = vld [vmem:[#allocation4] sm:$0xff] }
 0x4b3   : > { %v801_v1 = vmul.f32 %v1168_v62, %v785_v63 }
 0x4b5   : > { %v805_v3 = vadd.f32 %v804_v2, %v801_v1 }
 0x4b7   : > { %807 = vst.msk [vmem:[#allocation4] sm:$0xff] %vm806_vm9, %v805_v3 }
 0x4be   : > { %v876_v5 = vld [vmem:[#allocation4] sm:$0xff] }
 0x4bf   : > { %1169 = vrcp.f32 %v876_v5 }
 0x4c9   : > { %v1170_v6 = vpop.eup %1169 }
 0x4ca   : > { %881 = vperm.xlu1 %1146, %v1170_v6  }
 0x4ce   : > { %1148 = vset.pattern.permute.xlu1 %v1203_v60 }
 0x4cf   : > { %891 = vperm.xlu1 %1148, %v1170_v6  }
 0x4d3   : > { %1149 = vset.pattern.permute.xlu1 %v1204_v4 }
 0x4d4   : > { %896 = vperm.xlu1 %1149, %v1170_v6  }
 0x4e3   : > { %v581_v7 = vpop.f32.mrb[4].mxu0 }
 0x4e4   : > { %588 = vrot.lane.b32.xlu0 %v581_v7, %s1205_s29  ;;  %v1075_v8 = vpop.f32.mrb[5].mxu0 }
 0x4e5   : > { %v584_v9 = vpop.f32.mrb[6].mxu0 }
 0x4e6   : > { %v1076_v10 = vpop.f32.mrb[7].mxu0 }
 0x4ee   : > { %v720_v11 = vpop.f32.mrb[8].mxu0 }
 0x4ef   : > { %727 = vrot.lane.b32.xlu0 %v720_v11, %s1206_s30  ;;  %v1087_v12 = vpop.f32.mrb[9].mxu0 }
 0x4f0   : > { %v723_v13 = vpop.f32.mrb[10].mxu0 }
 0x4f1   : > { %v1088_v15 = vpop.f32.mrb[11].mxu0 }
 0x4f3   : > { %812 = vperm.xlu0 %1145, %v1168_v62  }
 0x4f7   : > { %v859_v16 = vpop.f32.mrb[12].mxu0  ;;  %1147 = vset.pattern.permute.xlu0 %v1202_v58 }
 0x4f8   : > { %866 = vrot.lane.b32.xlu0 %v859_v16, %s1207_s4  ;;  %v1099_v60 = vpop.f32.mrb[13].mxu0 }
 0x4f9   : > { %v862_v17 = vpop.f32.mrb[14].mxu0 }
 0x4fa   : > { %v1100_v18 = vpop.f32.mrb[15].mxu0 }
 0x4fc   : > { %886 = vperm.xlu0 %1147, %v1170_v6  }
 0x500   : > { %1150 = vset.pattern.permute.xlu0 %v1204_v4 }
 0x549   : > { %v882_v30 = vpop.permute.xlu1 %881 }
 0x54e   : > { %v892_v32 = vpop.permute.xlu1 %891 }
 0x553   : > { %v897_v39 = vpop.permute.xlu1 %896 }
 0x556   : > { %v589_v21 = vpop.permute.xlu0 %588 }
 0x557   : > { %v591_v22 = vadd.f32 %v589_v21, %v534_v20 }
 0x559   : > { %593 = vst.msk [vmem:[#allocation2] sm:$0xff] %vm592_vm10, %v591_v22 }
 0x560   : > { %v670_v24 = vld [vmem:[#allocation2] sm:$0xff] }
 0x561   : > { %v676_v25 = vmul.f32 %v674_v23, %v670_v24  ;;  %v728_v26 = vpop.permute.xlu0 %727 }
 0x563   : > { %v730_v58 = vadd.f32 %v728_v26, %v676_v25 }
 0x565   : > { %732 = vst.msk [vmem:[#allocation2] sm:$0xff] %vm731_vm11, %v730_v58 }
 0x56c   : > { %v809_v28 = vld [vmem:[#allocation2] sm:$0xff] }
 0x572   : > { %v813_v27 = vpop.permute.xlu0 %812 }
 0x573   : > { %v815_v29 = vmul.f32 %v813_v27, %v809_v28 }
 0x576   : > { %v867_v4 = vpop.permute.xlu0 %866 }
 0x577   : > { %v869_v31 = vadd.f32 %v867_v4, %v815_v29 }
 0x579   : > { %871 = vst.msk [vmem:[#allocation2] sm:$0xff] %vm870_vm12, %v869_v31 }
 0x57b   : > { %v887_v34 = vpop.permute.xlu0 %886 }
 0x580   : > { %v878_v33 = vld [vmem:[#allocation2] sm:$0xff] }
 0x581   : > { %v884_v35 = vmul.f32 %v882_v30, %v878_v33  ;;  %v894_v36 = vmul.f32 %v892_v32, %v878_v33  ;;  %v889_v38 = vmul.f32 %v887_v34, %v878_v33  ;;  %v899_v40 = vmul.f32 %v897_v39, %v878_v33 }
 0x583   : > { %v901_v37 = vsel %vm316_vm1, %v884_v35, %v889_v38 }
 0x584   : > { %v903_v41 = vsel %vm902_vm13, %v901_v37, %v894_v36 }
 0x585   : > { %v905_v42 = vsel %vm904_vm14, %v903_v41, %v899_v40 }
 0x586   : > { %907 = vst.msk [vmem:[%s287_s8] sm:$0xff] %vm296_vm7, %v905_v42 }
 0x587 PF: > { %s13_s14 = sadd.s32 1, %s1193_s14   ;;  %s1439_s12 = smov %s1189_s13 }
 0x588   : > { %p10_p5 = scmp.ge.s32.totalorder %s13_s14, 4   ;;  %s1440_s13 = smov %s1442_s15 }
 0x58a   :  { %12 = sbr.rel (!%p10_p5) target bundleno = 2 (0x2), region = 80 }

</bundles_post_ra>
